<compile_context>
chip_gen: v6e
topology: v6e:2x2x1
jax: 0.10.0
libtpu: 0.0.40
codegen_flags: <defaults>
</compile_context>

<pallas_src>
import functools

import jax
import jax.numpy as jnp
from jax.experimental import pallas as pl
from jax.experimental.pallas import tpu as pltpu


def _round_up(x, m):
    return (x + m - 1) // m * m


def _cdiv(a, b):
    return (a + b - 1) // b


def _skipgram_loss_kernel(u_idx_ref, v_idx_ref, u_tab_ref, v_tab_ref, out_ref,
                          *, tile_rows, k_chunk, n_k, n_pos, n_valid,
                          tiles_per_split):
    """One grid step over `tile_rows` fused (pos+neg) index pairs."""
    c = pl.program_id(0)          # parallel split (megacore on v7x)
    t = pl.program_id(1)          # tile within split (reduction axis)

    u_idx = u_idx_ref[...]        # (T, 1) int32 row ids
    v_idx = v_idx_ref[...]        # (T, 1) int32 row ids
    tab_dtype = u_tab_ref.dtype
    d = u_tab_ref.shape[-1]

    def gather_contrib(col_start, u_slab, v_slab):
        # One-hot gather on the MXU: (T, K) @ (K, D) -> (T, D).  The one-hot
        # is built in the table's native dtype (0/1 are exact in bf16), so no
        # full-table cast / f32 copy is ever materialized.
        col = col_start + jax.lax.broadcasted_iota(
            jnp.int32, (tile_rows, k_chunk), 1)
        oh_u = (col == u_idx).astype(tab_dtype)
        oh_v = (col == v_idx).astype(tab_dtype)
        return (jnp.dot(oh_u, u_slab, preferred_element_type=jnp.float32),
                jnp.dot(oh_v, v_slab, preferred_element_type=jnp.float32))

    if n_k == 1:
        eu, ev = gather_contrib(0, u_tab_ref[...], v_tab_ref[...])
    else:
        # Chunk the vocab (contraction) axis to bound the live one-hot size.
        def body(k, carry):
            eu_acc, ev_acc = carry
            start = pl.multiple_of(k * k_chunk, k_chunk)
            du, dv = gather_contrib(k * k_chunk,
                                    u_tab_ref[pl.ds(start, k_chunk), :],
                                    v_tab_ref[pl.ds(start, k_chunk), :])
            return eu_acc + du, ev_acc + dv

        zeros = jnp.zeros((tile_rows, d), jnp.float32)
        eu, ev = jax.lax.fori_loop(0, n_k, body, (zeros, zeros),
                                   unroll=(n_k <= 8))

    # torch.mul + torch.sum(dim=1)  ->  (T, 1)
    score = jnp.sum(eu * ev, axis=1, keepdims=True)

    # Fused positive / negative paths: rows [0, n_pos) get +score, the rest
    # -score; rows past n_valid are batch padding and contribute 0.
    gid = ((c * tiles_per_split + t) * tile_rows
           + jax.lax.broadcasted_iota(jnp.int32, (tile_rows, 1), 0))
    sign = jnp.where(gid < n_pos, 1.0, -1.0)
    valid = (gid < n_valid).astype(jnp.float32)

    x = sign * score
    # Numerically stable logsigmoid: min(x, 0) - log1p(exp(-|x|))
    log_sig = jnp.minimum(x, 0.0) - jnp.log1p(jnp.exp(-jnp.abs(x)))
    tile_sum = jnp.sum(valid * log_sig)

    # Per-split accumulator: the output block is resident across the
    # "arbitrary" tile axis; init on the first tile, then accumulate.
    @pl.when(t == 0)
    def _():
        out_ref[...] = jnp.zeros_like(out_ref)

    out_ref[...] = out_ref[...] + tile_sum


def _vmem_budget_bytes():
    """Generation-aware VMEM cap (128 MiB on v5e/v6e, 64 MiB per TC on v7x)."""
    vmem_cap = None
    try:
        info = pltpu.get_tpu_info()
        vmem_cap = getattr(info, "vmem_capacity_bytes", None)
    except Exception:
        vmem_cap = None
    if not vmem_cap:
        vmem_cap = 64 * 1024 * 1024          # conservative fallback (v7x per-TC)
    # Leave headroom for Mosaic internal scratch / pipeline buffers.
    return max(32 * 1024 * 1024,
               min(int(vmem_cap) - 16 * 1024 * 1024, 100 * 1024 * 1024))


def skipgram_forward(u_weight, v_weight, pos_u, pos_v, neg_u, neg_v,
                     *, max_tile_rows=512):
    """loss = -(sum logsigmoid(U[pos_u]·V[pos_v]) + sum logsigmoid(-U[neg_u]·V[neg_v]))."""
    vocab, d = u_weight.shape
    assert v_weight.shape == (vocab, d)

    n_pos = int(pos_u.shape[0])
    n_neg = int(neg_u.shape[0])
    n_valid = n_pos + n_neg
    if n_valid == 0:                      # empty batch -> empty grid guard
        return jnp.zeros((), jnp.float32)

    # Fuse positive and negative paths into a single batch of index pairs.
    u_idx = jnp.concatenate([pos_u, neg_u]).astype(jnp.int32)
    v_idx = jnp.concatenate([pos_v, neg_v]).astype(jnp.int32)

    # Batch tiling: large tiles -> few grid steps and minimal padding.
    tile_rows = min(max_tile_rows, _round_up(n_valid, 8))
    num_tiles = _cdiv(n_valid, tile_rows)
    # Leading "parallel" axis: one resident accumulator per v7x TensorCore.
    n_splits = 2 if num_tiles >= 2 else 1
    tiles_per_split = _cdiv(num_tiles, n_splits)
    rows_pad = n_splits * tiles_per_split * tile_rows
    u_idx = jnp.pad(u_idx, (0, rows_pad - n_valid)).reshape(rows_pad, 1)
    v_idx = jnp.pad(v_idx, (0, rows_pad - n_valid)).reshape(rows_pad, 1)

    # Vocab (one-hot contraction) chunking: lane-aligned, bounded live set.
    k_chunk = 512
    vocab_pad = _round_up(vocab, 128)
    if vocab_pad <= k_chunk:
        k_chunk = vocab_pad
    else:
        vocab_pad = _round_up(vocab, k_chunk)
    n_k = vocab_pad // k_chunk

    if vocab_pad != vocab:
        # Padded rows are never indexed, so the math is unchanged.
        u_tab = jnp.pad(u_weight, ((0, vocab_pad - vocab), (0, 0)))
        v_tab = jnp.pad(v_weight, ((0, vocab_pad - vocab), (0, 0)))
    else:
        u_tab, v_tab = u_weight, v_weight

    # VMEM accounting: tables are whole-array, single-copy VMEM residents
    # (no double-buffering); VMEM layouts pad the minor dim to 128 lanes.
    vmem_limit = _vmem_budget_bytes()
    itemsize = jnp.dtype(u_tab.dtype).itemsize
    d_pad = _round_up(d, 128)
    table_bytes = 2 * vocab_pad * d_pad * itemsize
    onehot_bytes = tile_rows * k_chunk * (2 * itemsize + 4)   # oh_u + oh_v + iota
    acc_bytes = 2 * tile_rows * d_pad * 4                     # eu / ev accumulators
    idx_bytes = 2 * 2 * tile_rows * 128 * 4                   # 2 inputs, double-buffered
    est_bytes = table_bytes + onehot_bytes + acc_bytes + idx_bytes
    if est_bytes > int(0.75 * vmem_limit):
        # TODO(synk): large-vocab path — keep the tables at memory_space=pl.ANY
        # and DMA-gather index-sorted row pages with pltpu.make_async_copy
        # instead of holding the whole table in VMEM.
        raise NotImplementedError(
            "Embedding tables too large for the VMEM-resident gather path")

    kernel = functools.partial(
        _skipgram_loss_kernel,
        tile_rows=tile_rows,
        k_chunk=k_chunk,
        n_k=n_k,
        n_pos=n_pos,
        n_valid=n_valid,
        tiles_per_split=tiles_per_split,
    )

    idx_spec = pl.BlockSpec((tile_rows, 1),
                            lambda c, t: (c * tiles_per_split + t, 0))
    # Whole-table, single-copy VMEM residents (no pipelining / double-buffer).
    tab_spec = pl.BlockSpec(memory_space=pltpu.MemorySpace.VMEM)

    partials = pl.pallas_call(
        kernel,
        out_shape=jax.ShapeDtypeStruct((n_splits, 1, 1), jnp.float32),
        grid_spec=pltpu.PrefetchScalarGridSpec(
            num_scalar_prefetch=0,
            grid=(n_splits, tiles_per_split),
            in_specs=[idx_spec, idx_spec, tab_spec, tab_spec],
            out_specs=pl.BlockSpec((1, 1, 1), lambda c, t: (c, 0, 0)),
        ),
        compiler_params=pltpu.CompilerParams(
            dimension_semantics=("parallel", "arbitrary"),
            vmem_limit_bytes=vmem_limit,
        ),
    )(u_idx, v_idx, u_tab, v_tab)

    # loss = -1 * (sum(logsigmoid(pos)) + sum(logsigmoid(-neg)))
    return -jnp.sum(partials)


def _ref_forward(uw, vw, pu, pv, nu, nv):
    """Pure-JAX reference (identical to the PyTorch forward)."""
    eu = jnp.take(uw, pu, axis=0)
    ev = jnp.take(vw, pv, axis=0)
    nue = jnp.take(uw, nu, axis=0)
    nve = jnp.take(vw, nv, axis=0)
    ps = jax.nn.log_sigmoid(jnp.sum(eu * ev, axis=1))
    ns = jax.nn.log_sigmoid(-jnp.sum(nue * nve, axis=1))
    return -(jnp.sum(ps) + jnp.sum(ns))


if __name__ == "__main__":
    # SkipGramModel.__init__: embed_size (vocab) = 64 -> tables have
    # 2*embed_size - 1 = 127 rows; embed_dims = 32; batch_size = 150
    # positive pairs + 150 negatives.
    embed_size = 64
    embed_dims = 32
    num_rows = 2 * embed_size - 1
    n_pos = 150
    n_neg = 150

    key = jax.random.PRNGKey(0)
    k_u, k_v, k_pu, k_pv, k_nu, k_nv = jax.random.split(key, 6)

    initrange = 0.5 / embed_dims
    u_weight = jax.random.uniform(
        k_u, (num_rows, embed_dims), dtype=jnp.float32,
        minval=-initrange, maxval=initrange)
    # init_emb() zeroes V; small random values make the numeric check
    # meaningful (forward semantics do not depend on the init).
    v_weight = jax.random.uniform(
        k_v, (num_rows, embed_dims), dtype=jnp.float32,
        minval=-initrange, maxval=initrange)

    pos_u = jax.random.randint(k_pu, (n_pos,), 0, embed_size, dtype=jnp.int32)
    pos_v = jax.random.randint(k_pv, (n_pos,), 0, embed_size, dtype=jnp.int32)
    neg_u = jax.random.randint(k_nu, (n_neg,), 0, embed_size, dtype=jnp.int32)
    neg_v = jax.random.randint(k_nv, (n_neg,), 0, embed_size, dtype=jnp.int32)

    loss = skipgram_forward(u_weight, v_weight, pos_u, pos_v, neg_u, neg_v)
    jax.block_until_ready(loss)
    ref = _ref_forward(u_weight, v_weight, pos_u, pos_v, neg_u, neg_v)
    assert jnp.allclose(loss, ref, rtol=1e-4, atol=1e-4), (loss, ref)

    # Also exercise the multi-tile / megacore-split / vocab-chunked paths.
    vocab2, d2, np2, nn2 = 700, 32, 600, 600
    k2 = jax.random.split(jax.random.PRNGKey(1), 6)
    uw2 = jax.random.uniform(k2[0], (vocab2, d2), jnp.float32, -0.02, 0.02)
    vw2 = jax.random.uniform(k2[1], (vocab2, d2), jnp.float32, -0.02, 0.02)
    pu2 = jax.random.randint(k2[2], (np2,), 0, vocab2, dtype=jnp.int32)
    pv2 = jax.random.randint(k2[3], (np2,), 0, vocab2, dtype=jnp.int32)
    nu2 = jax.random.randint(k2[4], (nn2,), 0, vocab2, dtype=jnp.int32)
    nv2 = jax.random.randint(k2[5], (nn2,), 0, vocab2, dtype=jnp.int32)
    loss2 = skipgram_forward(uw2, vw2, pu2, pv2, nu2, nv2)
    jax.block_until_ready(loss2)
    ref2 = _ref_forward(uw2, vw2, pu2, pv2, nu2, nv2)
    assert jnp.allclose(loss2, ref2, rtol=1e-4, atol=1e-3), (loss2, ref2)

    print("KERNEL_OK")
</pallas_src>

<mosaic_0001>
module attributes {stable_mosaic.version = 11 : i64} {
  func.func @_skipgram_loss_kernel(%arg0: i32, %arg1: i32, %arg2: memref<304x1xi32, #tpu.memory_space<vmem>>, %arg3: memref<304x1xi32, #tpu.memory_space<vmem>>, %arg4: memref<128x32xf32, #tpu.memory_space<vmem>>, %arg5: memref<128x32xf32, #tpu.memory_space<vmem>>, %arg6: memref<1x1x1xf32, #tpu.memory_space<vmem>>) attributes {dimension_semantics = [#tpu.dimension_semantics<parallel>, #tpu.dimension_semantics<arbitrary>], iteration_bounds = array<i64: 1, 1>, scalar_prefetch = 0 : i64, scratch_operands = 0 : i64, tpu.core_type = #tpu.core_type<tc>, window_params = [{transform_indices = @transform_0, window_bounds = array<i64: 304, 1>}, {transform_indices = @transform_1, window_bounds = array<i64: 304, 1>}, {pipeline_mode = #tpu.pipeline_mode<synchronous>, transform_indices = @transform_2, window_bounds = array<i64: 128, 32>}, {pipeline_mode = #tpu.pipeline_mode<synchronous>, transform_indices = @transform_3, window_bounds = array<i64: 128, 32>}, {transform_indices = @transform_4, window_bounds = array<i64: 1, 1, 1>}]} {
    %c0 = arith.constant 0 : index
    %c0_0 = arith.constant 0 : index
    %0 = vector.load %arg2[%c0, %c0_0] : memref<304x1xi32, #tpu.memory_space<vmem>>, vector<304x1xi32>
    %c0_1 = arith.constant 0 : index
    %c0_2 = arith.constant 0 : index
    %1 = vector.load %arg3[%c0_1, %c0_2] : memref<304x1xi32, #tpu.memory_space<vmem>>, vector<304x1xi32>
    %c0_3 = arith.constant 0 : index
    %c0_4 = arith.constant 0 : index
    %2 = vector.load %arg4[%c0_3, %c0_4] : memref<128x32xf32, #tpu.memory_space<vmem>>, vector<128x32xf32>
    %c0_5 = arith.constant 0 : index
    %c0_6 = arith.constant 0 : index
    %3 = vector.load %arg5[%c0_5, %c0_6] : memref<128x32xf32, #tpu.memory_space<vmem>>, vector<128x32xf32>
    %4 = tpu.iota {dimensions = array<i32: 1>} : vector<304x128xi32>
    %c0_i32 = arith.constant 0 : i32
    %5 = vector.broadcast %c0_i32 : i32 to vector<304x128xi32>
    %6 = arith.addi %5, %4 : vector<304x128xi32>
    %7 = vector.broadcast %0 : vector<304x1xi32> to vector<304x128xi32>
    %8 = arith.cmpi eq, %6, %7 : vector<304x128xi32>
    %9 = arith.extui %8 : vector<304x128xi1> to vector<304x128xi32>
    %10 = arith.sitofp %9 : vector<304x128xi32> to vector<304x128xf32>
    %11 = vector.broadcast %1 : vector<304x1xi32> to vector<304x128xi32>
    %12 = arith.cmpi eq, %6, %11 : vector<304x128xi32>
    %13 = arith.extui %12 : vector<304x128xi1> to vector<304x128xi32>
    %14 = arith.sitofp %13 : vector<304x128xi32> to vector<304x128xf32>
    %cst = arith.constant dense<0.000000e+00> : vector<304x32xf32>
    %15 = tpu.matmul %10, %2, %cst {dimension_numbers = #tpu.dot_dimension_numbers<[1], [0], [0], [1], [0, 0, 1, 1], [], []>} : vector<304x128xf32>, vector<128x32xf32>, vector<304x32xf32> -> vector<304x32xf32>
    %cst_7 = arith.constant dense<0.000000e+00> : vector<304x32xf32>
    %16 = tpu.matmul %14, %3, %cst_7 {dimension_numbers = #tpu.dot_dimension_numbers<[1], [0], [0], [1], [0, 0, 1, 1], [], []>} : vector<304x128xf32>, vector<128x32xf32>, vector<304x32xf32> -> vector<304x32xf32>
    %17 = arith.mulf %15, %16 : vector<304x32xf32>
    %cst_8 = arith.constant dense<0.000000e+00> : vector<304xf32>
    %18 = vector.multi_reduction <add>, %17, %cst_8 [1] : vector<304x32xf32> to vector<304xf32>
    %19 = vector.shape_cast %18 : vector<304xf32> to vector<304x1xf32>
    %c1_i32 = arith.constant 1 : i32
    %20 = arith.muli %arg0, %c1_i32 : i32
    %21 = arith.addi %20, %arg1 : i32
    %c304_i32 = arith.constant 304 : i32
    %22 = arith.muli %21, %c304_i32 : i32
    %23 = tpu.iota {dimensions = array<i32: 0>} : vector<304x1xi32>
    %24 = vector.broadcast %22 : i32 to vector<304x1xi32>
    %25 = arith.addi %24, %23 : vector<304x1xi32>
    %c150_i32 = arith.constant 150 : i32
    %26 = vector.broadcast %c150_i32 : i32 to vector<304x1xi32>
    %27 = arith.cmpi slt, %25, %26 : vector<304x1xi32>
    %cst_9 = arith.constant 1.000000e+00 : f32
    %cst_10 = arith.constant -1.000000e+00 : f32
    %28 = vector.broadcast %cst_9 : f32 to vector<304x1xf32>
    %29 = vector.broadcast %cst_10 : f32 to vector<304x1xf32>
    %30 = arith.select %27, %28, %29 : vector<304x1xi1>, vector<304x1xf32>
    %c300_i32 = arith.constant 300 : i32
    %31 = vector.broadcast %c300_i32 : i32 to vector<304x1xi32>
    %32 = arith.cmpi slt, %25, %31 : vector<304x1xi32>
    %33 = arith.extui %32 : vector<304x1xi1> to vector<304x1xi32>
    %34 = arith.sitofp %33 : vector<304x1xi32> to vector<304x1xf32>
    %35 = arith.mulf %30, %19 : vector<304x1xf32>
    %cst_11 = arith.constant 0.000000e+00 : f32
    %36 = vector.broadcast %cst_11 : f32 to vector<304x1xf32>
    %37 = arith.minimumf %35, %36 : vector<304x1xf32>
    %38 = math.absf %35 : vector<304x1xf32>
    %cst_12 = arith.constant 0.000000e+00 : f32
    %39 = vector.broadcast %cst_12 : f32 to vector<304x1xf32>
    %40 = arith.subf %39, %38 : vector<304x1xf32>
    %41 = math.exp %40 : vector<304x1xf32>
    %42 = math.log1p %41 : vector<304x1xf32>
    %43 = arith.subf %37, %42 : vector<304x1xf32>
    %44 = arith.mulf %34, %43 : vector<304x1xf32>
    %45 = vector.shape_cast %44 : vector<304x1xf32> to vector<1x304x1xf32>
    %cst_13 = arith.constant dense<0.000000e+00> : vector<1xf32>
    %46 = vector.multi_reduction <add>, %45, %cst_13 [1, 2] : vector<1x304x1xf32> to vector<1xf32>
    %47 = vector.shape_cast %46 : vector<1xf32> to vector<1x1x1xf32>
    %48 = vector.extract %47[0, 0, 0] : f32 from vector<1x1x1xf32>
    %c0_i32_14 = arith.constant 0 : i32
    %49 = arith.cmpi eq, %arg1, %c0_i32_14 : i32
    %50 = arith.extui %49 : i1 to i32
    %c0_i32_15 = arith.constant 0 : i32
    %51 = arith.cmpi ne, %50, %c0_i32_15 : i32
    scf.if %51 {
      %cst_22 = arith.constant 0.000000e+00 : f32
      %56 = vector.broadcast %cst_22 : f32 to vector<1x1x1xf32>
      %c0_23 = arith.constant 0 : index
      %c0_24 = arith.constant 0 : index
      %c0_25 = arith.constant 0 : index
      %57 = vector.load %arg6[%c0_23, %c0_24, %c0_25] : memref<1x1x1xf32, #tpu.memory_space<vmem>>, vector<1x1x1xf32>
      tpu.vector_store %arg6[%c0_23, %c0_24, %c0_25], %56 {strides = array<i32>} : memref<1x1x1xf32, #tpu.memory_space<vmem>>, vector<1x1x1xf32>,
    } else {
    }
    %c0_16 = arith.constant 0 : index
    %c0_17 = arith.constant 0 : index
    %c0_18 = arith.constant 0 : index
    %52 = vector.load %arg6[%c0_16, %c0_17, %c0_18] : memref<1x1x1xf32, #tpu.memory_space<vmem>>, vector<1x1x1xf32>
    %53 = vector.broadcast %48 : f32 to vector<1x1x1xf32>
    %54 = arith.addf %52, %53 : vector<1x1x1xf32>
    %c0_19 = arith.constant 0 : index
    %c0_20 = arith.constant 0 : index
    %c0_21 = arith.constant 0 : index
    %55 = vector.load %arg6[%c0_19, %c0_20, %c0_21] : memref<1x1x1xf32, #tpu.memory_space<vmem>>, vector<1x1x1xf32>
    tpu.vector_store %arg6[%c0_19, %c0_20, %c0_21], %54 {strides = array<i32>} : memref<1x1x1xf32, #tpu.memory_space<vmem>>, vector<1x1x1xf32>,
    return
  }
  func.func @transform_0(%arg0: i32, %arg1: i32) -> (i32, i32) {
    %c1_i32 = arith.constant 1 : i32
    %0 = arith.muli %arg0, %c1_i32 : i32
    %1 = arith.addi %0, %arg1 : i32
    %c0_i32 = arith.constant 0 : i32
    %c0_i32_0 = arith.constant 0 : i32
    return %1, %c0_i32 : i32, i32
  }
  func.func @transform_1(%arg0: i32, %arg1: i32) -> (i32, i32) {
    %c1_i32 = arith.constant 1 : i32
    %0 = arith.muli %arg0, %c1_i32 : i32
    %1 = arith.addi %0, %arg1 : i32
    %c0_i32 = arith.constant 0 : i32
    %c0_i32_0 = arith.constant 0 : i32
    return %1, %c0_i32 : i32, i32
  }
  func.func @transform_2(%arg0: i32, %arg1: i32) -> (i32, i32) {
    %c0_i32 = arith.constant 0 : i32
    %c0_i32_0 = arith.constant 0 : i32
    %c0_i32_1 = arith.constant 0 : i32
    return %c0_i32, %c0_i32_0 : i32, i32
  }
  func.func @transform_3(%arg0: i32, %arg1: i32) -> (i32, i32) {
    %c0_i32 = arith.constant 0 : i32
    %c0_i32_0 = arith.constant 0 : i32
    %c0_i32_1 = arith.constant 0 : i32
    return %c0_i32, %c0_i32_0 : i32, i32
  }
  func.func @transform_4(%arg0: i32, %arg1: i32) -> (i32, i32, i32) {
    %c0_i32 = arith.constant 0 : i32
    %c0_i32_0 = arith.constant 0 : i32
    %c0_i32_1 = arith.constant 0 : i32
    return %arg0, %c0_i32, %c0_i32_0 : i32, i32, i32
  }
}

</mosaic_0001>

<bundles_post_ra>
// kernel: tpu_custom_call.1
= control target key start
LH: loop header
LB: loop body
LE: loop exit
PB: predicated region body
PF: predicated region fallthrough
CT: control target
= control target key end

     0   :  { %v2951_v2 = vmov 0   ;;  %s4190_s0 = inlined_call_operand.vmem [shape: s32[304,1], index: 0, kind: input, shape index: {}]   ;;  %s4191_s1 = inlined_call_operand.vmem [shape: s32[304,1], index: 1, kind: input, shape index: {}]   ;;  %s4192_s2 = inlined_call_operand.vmem [shape: f32[128,32], index: 2, kind: input, shape index: {}]   ;;  %s4193_s3 = inlined_call_operand.vmem [shape: f32[128,32], index: 3, kind: input, shape index: {}]   ;;  %s4194_s4 = inlined_call_operand.hbm [shape: f32[1,1,1], index: 4, kind: output, shape index: {}]  }
   0x1   :  { %v63_v0 = vld [vmem:[%s4190_s0 + $0x8] sm:$0xff]  ;;  %v62_v1 = vld [vmem:[%s4190_s0] sm:$0xff]  ;;  %2776 = vset.pattern.permute.xlu1 %v2951_v2  ;;  %2775 = vset.pattern.permute.xlu0 %v2951_v2  ;;  %v102_v5 = vld [vmem:[%s4191_s1 + $0x10] sm:$0xff] }
   0x2   :  { %176 = vperm.xlu1 %2776, %v63_v0   ;;  %173 = vperm.xlu0 %2775, %v62_v1   ;;  %v101_v3 = vld [vmem:[%s4191_s1 + $0x8] sm:$0xff]  ;;  %v100_v4 = vld [vmem:[%s4191_s1] sm:$0xff]  ;;  %v64_v6 = vld [vmem:[%s4190_s0 + $0x10] sm:$0xff] }
   0x3   :  { %v103_v7 = vld [vmem:[%s4191_s1 + $0x18] sm:$0xff]  ;;  %v104_v9 = vld [vmem:[%s4191_s1 + $0x20] sm:$0xff]  ;;  %v152_v12 = vld [vmem:[%s4192_s2 + $0x70] sm:$0xff] }
   0x4   :  { %v65_v8 = vld [vmem:[%s4190_s0 + $0x18] sm:$0xff]  ;;  %v66_v10 = vld [vmem:[%s4190_s0 + $0x20] sm:$0xff]  ;;  %v168_v14 = vld [vmem:[%s4193_s3 + $0x70] sm:$0xff] }
   0x5   :  { %v153_v11 = vld [vmem:[%s4192_s2 + $0x78] sm:$0xff]  ;;  %v105_v15 = vld [vmem:[%s4191_s1 + $0x28] sm:$0xff]  ;;  %v150_v19 = vld [vmem:[%s4192_s2 + $0x60] sm:$0xff] }
   0x6   :  { %404 = vperm.xlu1 %2776, %v101_v3   ;;  %401 = vperm.xlu0 %2775, %v100_v4   ;;  %v169_v13 = vld [vmem:[%s4193_s3 + $0x78] sm:$0xff]  ;;  %v67_v16 = vld [vmem:[%s4190_s0 + $0x28] sm:$0xff]  ;;  %v106_v20 = vld [vmem:[%s4191_s1 + $0x30] sm:$0xff] }
   0x7   :  { %2590 = vmatprep.subr.mxu0 %v153_v11  ;;  %2679 = vmatprep.subr.mxu1 %v169_v13  ;;  %v151_v17 = vld [vmem:[%s4192_s2 + $0x68] sm:$0xff]  ;;  %v68_v21 = vld [vmem:[%s4190_s0 + $0x30] sm:$0xff]  ;;  %v166_v22 = vld [vmem:[%s4193_s3 + $0x60] sm:$0xff] }
   0x8   :  { %2591 = vmatpush3.msra.mxu0 %v153_v11  ;;  %2680 = vmatpush3.msra.mxu1 %v169_v13  ;;  %v167_v18 = vld [vmem:[%s4193_s3 + $0x68] sm:$0xff]  ;;  %v149_v23 = vld [vmem:[%s4192_s2 + $0x58] sm:$0xff]  ;;  %v148_v27 = vld [vmem:[%s4192_s2 + $0x50] sm:$0xff] }
   0x9   :  { %2592 = vmatprep.subr.mxu0 %v152_v12  ;;  %2681 = vmatprep.subr.mxu1 %v168_v14  ;;  %v165_v24 = vld [vmem:[%s4193_s3 + $0x58] sm:$0xff]  ;;  %v164_v28 = vld [vmem:[%s4193_s3 + $0x50] sm:$0xff]  ;;  %v147_v29 = vld [vmem:[%s4192_s2 + $0x48] sm:$0xff] }
   0xa   :  { %407 = vperm.xlu1 %2776, %v102_v5   ;;  %179 = vperm.xlu0 %2775, %v64_v6   ;;  %v107_v25 = vld [vmem:[%s4191_s1 + $0x38] sm:$0xff]  ;;  %v108_v30 = vld [vmem:[%s4191_s1 + $0x40] sm:$0xff]  ;;  %v163_v32 = vld [vmem:[%s4193_s3 + $0x48] sm:$0xff] }
   0xb   :  { %2593 = vmatpush3.msra.mxu0 %v152_v12  ;;  %2682 = vmatpush3.msra.mxu1 %v168_v14  ;;  %v69_v26 = vld [vmem:[%s4190_s0 + $0x38] sm:$0xff]  ;;  %v70_v31 = vld [vmem:[%s4190_s0 + $0x40] sm:$0xff]  ;;  %v109_v35 = vld [vmem:[%s4191_s1 + $0x48] sm:$0xff] }
   0xc   :  { %2594 = vmatprep.subr.mxu0 %v151_v17  ;;  %2683 = vmatprep.subr.mxu1 %v167_v18  ;;  %v146_v33 = vld [vmem:[%s4192_s2 + $0x40] sm:$0xff]  ;;  %v71_v36 = vld [vmem:[%s4190_s0 + $0x48] sm:$0xff]  ;;  %v145_v37 = vld [vmem:[%s4192_s2 + $0x38] sm:$0xff] }
   0xd   :  { %2595 = vmatpush3.msra.mxu0 %v151_v17  ;;  %2684 = vmatpush3.msra.mxu1 %v167_v18  ;;  %v162_v34 = vld [vmem:[%s4193_s3 + $0x40] sm:$0xff] }
   0xe   :  { %410 = vperm.xlu1 %2776, %v103_v7   ;;  %182 = vperm.xlu0 %2775, %v65_v8  }
   0xf   :  { %2596 = vmatprep.subr.mxu0 %v150_v19  ;;  %2685 = vmatprep.subr.mxu1 %v166_v22 }
  0x10   :  { %2597 = vmatpush3.msra.mxu0 %v150_v19  ;;  %2686 = vmatpush3.msra.mxu1 %v166_v22 }
  0x11   :  { %2598 = vmatprep.subr.mxu0 %v149_v23  ;;  %2687 = vmatprep.subr.mxu1 %v165_v24 }
  0x12   :  { %413 = vperm.xlu1 %2776, %v104_v9   ;;  %185 = vperm.xlu0 %2775, %v66_v10  }
  0x13   :  { %2599 = vmatpush3.msra.mxu0 %v149_v23  ;;  %2688 = vmatpush3.msra.mxu1 %v165_v24 }
  0x14   :  { %2600 = vmatprep.subr.mxu0 %v148_v27  ;;  %2689 = vmatprep.subr.mxu1 %v164_v28 }
  0x15   :  { %2601 = vmatpush3.msra.mxu0 %v148_v27  ;;  %2690 = vmatpush3.msra.mxu1 %v164_v28 }
  0x16   :  { %416 = vperm.xlu1 %2776, %v105_v15   ;;  %188 = vperm.xlu0 %2775, %v67_v16  }
  0x17   :  { %2602 = vmatprep.subr.mxu0 %v147_v29  ;;  %2691 = vmatprep.subr.mxu1 %v163_v32 }
  0x18   :  { %2603 = vmatpush3.msra.mxu0 %v147_v29  ;;  %2692 = vmatpush3.msra.mxu1 %v163_v32 }
  0x19   :  { %2604 = vmatprep.subr.mxu0 %v146_v33 }
  0x1a   :  { %419 = vperm.xlu1 %2776, %v106_v20   ;;  %191 = vperm.xlu0 %2775, %v68_v21  }
  0x1e   :  { %422 = vperm.xlu1 %2776, %v107_v25   ;;  %194 = vperm.xlu0 %2775, %v69_v26  }
  0x22   :  { %425 = vperm.xlu1 %2776, %v108_v30   ;;  %197 = vperm.xlu0 %2775, %v70_v31  }
  0x23   :  { %9 = vsyncpa [#allocation3], 0  ;;  %2605 = vmatpush3.msra.mxu0 %v146_v33  ;;  %2693 = vmatprep.subr.mxu1 %v162_v34  ;;  %v161_v38 = vld [vmem:[%s4193_s3 + $0x38] sm:$0xff]  ;;  %v144_v39 = vld [vmem:[%s4192_s2 + $0x30] sm:$0xff]  ;;  %v170_v29 = vlaneseq }
  0x24   :  { %v110_v40 = vld [vmem:[%s4191_s1 + $0x50] sm:$0xff]  ;;  %2606 = vmatprep.subr.mxu0 %v145_v37  ;;  %2694 = vmatpush3.msra.mxu1 %v162_v34  ;;  %v143_v43 = vld [vmem:[%s4192_s2 + $0x28] sm:$0xff]  ;;  %v111_v45 = vld [vmem:[%s4191_s1 + $0x58] sm:$0xff] }
  0x25   :  { %v72_v41 = vld [vmem:[%s4190_s0 + $0x50] sm:$0xff]  ;;  %2607 = vmatpush3.msra.mxu0 %v145_v37  ;;  %2695 = vmatprep.subr.mxu1 %v161_v38  ;;  %v159_v44 = vld [vmem:[%s4193_s3 + $0x28] sm:$0xff]  ;;  %v73_v46 = vld [vmem:[%s4190_s0 + $0x58] sm:$0xff]  ;;  %v3264_v32 = vand.u32 127, %v170_v29  ;;  %v2952_v37 = vmov 1.0  }
  0x26   :  { %428 = vperm.xlu1 %2776, %v109_v35   ;;  %200 = vperm.xlu0 %2775, %v71_v36   ;;  %v160_v42 = vld [vmem:[%s4193_s3 + $0x30] sm:$0xff]  ;;  %v142_v47 = vld [vmem:[%s4192_s2 + $0x20] sm:$0xff]  ;;  %v141_v49 = vld [vmem:[%s4192_s2 + $0x18] sm:$0xff] }
  0x27   :  { %2608 = vmatprep.subr.mxu0 %v144_v39  ;;  %2696 = vmatpush3.msra.mxu1 %v161_v38  ;;  %v158_v48 = vld [vmem:[%s4193_s3 + $0x20] sm:$0xff]  ;;  %v157_v52 = vld [vmem:[%s4193_s3 + $0x18] sm:$0xff]  ;;  %v140_v53 = vld [vmem:[%s4192_s2 + $0x10] sm:$0xff] }
  0x28   :  { %2609 = vmatpush3.msra.mxu0 %v144_v39  ;;  %2697 = vmatprep.subr.mxu1 %v160_v42  ;;  %v112_v50 = vld [vmem:[%s4191_s1 + $0x60] sm:$0xff]  ;;  %v156_v54 = vld [vmem:[%s4193_s3 + $0x10] sm:$0xff]  ;;  %v113_v55 = vld [vmem:[%s4191_s1 + $0x68] sm:$0xff] }
  0x29   :  { %2610 = vmatprep.subr.mxu0 %v143_v43  ;;  %2698 = vmatpush3.msra.mxu1 %v160_v42  ;;  %v74_v51 = vld [vmem:[%s4190_s0 + $0x60] sm:$0xff]  ;;  %v75_v56 = vld [vmem:[%s4190_s0 + $0x68] sm:$0xff]  ;;  %v114_v60 = vld [vmem:[%s4191_s1 + $0x70] sm:$0xff] }
  0x2a   :  { %431 = vperm.xlu1 %2776, %v110_v40   ;;  %203 = vperm.xlu0 %2775, %v72_v41   ;;  %v139_v57 = vld [vmem:[%s4192_s2 + $0x8] sm:$0xff]  ;;  %v138_v59 = vld [vmem:[%s4192_s2] sm:$0xff]  ;;  %v76_v61 = vld [vmem:[%s4190_s0 + $0x70] sm:$0xff] }
  0x2b   :  { %2611 = vmatpush3.msra.mxu0 %v143_v43  ;;  %2699 = vmatprep.subr.mxu1 %v159_v44  ;;  %v155_v58 = vld [vmem:[%s4193_s3 + $0x8] sm:$0xff]  ;;  %v154_v62 = vld [vmem:[%s4193_s3] sm:$0xff]  ;;  %v115_v63 = vld [vmem:[%s4191_s1 + $0x78] sm:$0xff] }
  0x2c   :  { %2612 = vmatprep.subr.mxu0 %v142_v47  ;;  %2700 = vmatpush3.msra.mxu1 %v159_v44  ;;  %v77_v0 = vld [vmem:[%s4190_s0 + $0x78] sm:$0xff]  ;;  %v116_v1 = vld [vmem:[%s4191_s1 + $0x80] sm:$0xff]  ;;  %v117_v3 = vld [vmem:[%s4191_s1 + $0x88] sm:$0xff] }
  0x2d   :  { %2613 = vmatpush3.msra.mxu0 %v142_v47  ;;  %2701 = vmatprep.subr.mxu1 %v158_v48  ;;  %v78_v2 = vld [vmem:[%s4190_s0 + $0x80] sm:$0xff]  ;;  %v79_v4 = vld [vmem:[%s4190_s0 + $0x88] sm:$0xff]  ;;  %v118_v5 = vld [vmem:[%s4191_s1 + $0x90] sm:$0xff] }
  0x2e   :  { %434 = vperm.xlu1 %2776, %v111_v45   ;;  %206 = vperm.xlu0 %2775, %v73_v46   ;;  %v80_v6 = vld [vmem:[%s4190_s0 + $0x90] sm:$0xff]  ;;  %v119_v7 = vld [vmem:[%s4191_s1 + $0x98] sm:$0xff]  ;;  %v120_v9 = vld [vmem:[%s4191_s1 + $0xa0] sm:$0xff] }
  0x2f   :  { %2614 = vmatprep.subr.mxu0 %v141_v49  ;;  %2702 = vmatpush3.msra.mxu1 %v158_v48  ;;  %v81_v8 = vld [vmem:[%s4190_s0 + $0x98] sm:$0xff]  ;;  %v82_v10 = vld [vmem:[%s4190_s0 + $0xa0] sm:$0xff]  ;;  %v121_v11 = vld [vmem:[%s4191_s1 + $0xa8] sm:$0xff] }
  0x30   :  { %2615 = vmatpush3.msra.mxu0 %v141_v49  ;;  %2703 = vmatprep.subr.mxu1 %v157_v52  ;;  %v83_v12 = vld [vmem:[%s4190_s0 + $0xa8] sm:$0xff]  ;;  %v122_v13 = vld [vmem:[%s4191_s1 + $0xb0] sm:$0xff]  ;;  %v123_v15 = vld [vmem:[%s4191_s1 + $0xb8] sm:$0xff] }
  0x31   :  { %2616 = vmatprep.subr.mxu0 %v140_v53  ;;  %2704 = vmatpush3.msra.mxu1 %v157_v52  ;;  %v84_v14 = vld [vmem:[%s4190_s0 + $0xb0] sm:$0xff]  ;;  %v85_v16 = vld [vmem:[%s4190_s0 + $0xb8] sm:$0xff]  ;;  %v124_v17 = vld [vmem:[%s4191_s1 + $0xc0] sm:$0xff] }
  0x32   :  { %437 = vperm.xlu1 %2776, %v112_v50   ;;  %209 = vperm.xlu0 %2775, %v74_v51   ;;  %v86_v18 = vld [vmem:[%s4190_s0 + $0xc0] sm:$0xff]  ;;  %v125_v19 = vld [vmem:[%s4191_s1 + $0xc8] sm:$0xff]  ;;  %v126_v21 = vld [vmem:[%s4191_s1 + $0xd0] sm:$0xff] }
  0x33   :  { %2617 = vmatpush3.msra.mxu0 %v140_v53  ;;  %2705 = vmatprep.subr.mxu1 %v156_v54  ;;  %v87_v20 = vld [vmem:[%s4190_s0 + $0xc8] sm:$0xff]  ;;  %v88_v22 = vld [vmem:[%s4190_s0 + $0xd0] sm:$0xff]  ;;  %v127_v23 = vld [vmem:[%s4191_s1 + $0xd8] sm:$0xff] }
  0x34   :  { %2618 = vmatprep.subr.mxu0 %v139_v57  ;;  %2706 = vmatpush3.msra.mxu1 %v156_v54  ;;  %v89_v24 = vld [vmem:[%s4190_s0 + $0xd8] sm:$0xff]  ;;  %v128_v25 = vld [vmem:[%s4191_s1 + $0xe0] sm:$0xff]  ;;  %v129_v27 = vld [vmem:[%s4191_s1 + $0xe8] sm:$0xff] }
  0x35   :  { %2619 = vmatpush3.msra.mxu0 %v139_v57  ;;  %2707 = vmatprep.subr.mxu1 %v155_v58  ;;  %v90_v26 = vld [vmem:[%s4190_s0 + $0xe0] sm:$0xff]  ;;  %v91_v28 = vld [vmem:[%s4190_s0 + $0xe8] sm:$0xff]  ;;  %v130_v30 = vld [vmem:[%s4191_s1 + $0xf0] sm:$0xff] }
  0x36   :  { %440 = vperm.xlu1 %2776, %v113_v55   ;;  %212 = vperm.xlu0 %2775, %v75_v56   ;;  %v92_v31 = vld [vmem:[%s4190_s0 + $0xf0] sm:$0xff]  ;;  %v131_v33 = vld [vmem:[%s4191_s1 + $0xf8] sm:$0xff]  ;;  %v132_v38 = vld [vmem:[%s4191_s1 + $0x100] sm:$0xff] }
  0x37   :  { %2620 = vmatprep.subr.mxu0 %v138_v59  ;;  %2708 = vmatpush3.msra.mxu1 %v155_v58  ;;  %v93_v34 = vld [vmem:[%s4190_s0 + $0xf8] sm:$0xff]  ;;  %v94_v39 = vld [vmem:[%s4190_s0 + $0x100] sm:$0xff]  ;;  %v133_v42 = vld [vmem:[%s4191_s1 + $0x108] sm:$0xff] }
  0x38   :  { %2621 = vmatpush3.msra.mxu0 %v138_v59  ;;  %2709 = vmatprep.subr.mxu1 %v154_v62  ;;  %v95_v43 = vld [vmem:[%s4190_s0 + $0x108] sm:$0xff]  ;;  %v134_v46 = vld [vmem:[%s4191_s1 + $0x110] sm:$0xff]  ;;  %v135_v50 = vld [vmem:[%s4191_s1 + $0x118] sm:$0xff] }
  0x39   :  { %2710 = vmatpush3.msra.mxu1 %v154_v62  ;;  %v96_v47 = vld [vmem:[%s4190_s0 + $0x110] sm:$0xff]  ;;  %v97_v51 = vld [vmem:[%s4190_s0 + $0x118] sm:$0xff]  ;;  %v136_v54 = vld [vmem:[%s4191_s1 + $0x120] sm:$0xff] }
  0x3a   :  { %443 = vperm.xlu1 %2776, %v114_v60   ;;  %215 = vperm.xlu0 %2775, %v76_v61   ;;  %v98_v55 = vld [vmem:[%s4190_s0 + $0x120] sm:$0xff]  ;;  %v137_v58 = vld [vmem:[%s4191_s1 + $0x128] sm:$0xff] }
  0x3b   :  { %v99_v59 = vld [vmem:[%s4190_s0 + $0x128] sm:$0xff]  ;;  %s2955_s0 = smov [#allocation2]  }
  0x3c   :  { %s2309_s1 = sshll.u32 %s2955_s0, 4  ;;  %s2310_s1 = int_to_ptr.vmem [resolvable:$true] %s2309_s1 }
  0x3d   :  { %s2929_s16 = scalar_lea.vmem %s2310_s1, 16  ;;  %s2933_s17 = scalar_lea.vmem %s2310_s1, 32 }
  0x3e   :  { %446 = vperm.xlu1 %2776, %v115_v63   ;;  %218 = vperm.xlu0 %2775, %v77_v0   ;;  %p2930_p0 = scmp.ne.s32.totalorder %s2310_s1, %s2929_s16  ;;  %p2934_p1 = scmp.lt.s32.totalorder %s2310_s1, %s2310_s1 }
  0x3f   :  { %p2935_p2 = scmp.lt.s32.totalorder %s2933_s17, %s2929_s16 }
  0x41   :  { %p2936_p3 = por %p2935_p2, %p2934_p1 }
  0x42   :  { %449 = vperm.xlu1 %2776, %v116_v1   ;;  %221 = vperm.xlu0 %2775, %v78_v2  }
  0x43   :  { %p2937_p4 = pnand %p2936_p3, %p2930_p0 }
  0x46   :  { %452 = vperm.xlu1 %2776, %v117_v3   ;;  %224 = vperm.xlu0 %2775, %v79_v4  }
  0x4a   :  { %455 = vperm.xlu1 %2776, %v118_v5   ;;  %227 = vperm.xlu0 %2775, %v80_v6  }
  0x4e   :  { %458 = vperm.xlu1 %2776, %v119_v7   ;;  %230 = vperm.xlu0 %2775, %v81_v8  }
  0x52   :  { %461 = vperm.xlu1 %2776, %v120_v9   ;;  %233 = vperm.xlu0 %2775, %v82_v10  }
  0x56   :  { %464 = vperm.xlu1 %2776, %v121_v11   ;;  %236 = vperm.xlu0 %2775, %v83_v12  }
  0x5a   :  { %467 = vperm.xlu1 %2776, %v122_v13   ;;  %239 = vperm.xlu0 %2775, %v84_v14  }
  0x5e   :  { %470 = vperm.xlu1 %2776, %v123_v15   ;;  %242 = vperm.xlu0 %2775, %v85_v16  }
  0x62   :  { %473 = vperm.xlu1 %2776, %v124_v17   ;;  %245 = vperm.xlu0 %2775, %v86_v18  }
  0x66   :  { %476 = vperm.xlu1 %2776, %v125_v19   ;;  %248 = vperm.xlu0 %2775, %v87_v20  }
  0x6a   :  { %479 = vperm.xlu1 %2776, %v126_v21   ;;  %251 = vperm.xlu0 %2775, %v88_v22  }
  0x6e   :  { %482 = vperm.xlu1 %2776, %v127_v23   ;;  %254 = vperm.xlu0 %2775, %v89_v24  }
  0x72   :  { %485 = vperm.xlu1 %2776, %v128_v25   ;;  %257 = vperm.xlu0 %2775, %v90_v26  }
  0x76   :  { %488 = vperm.xlu1 %2776, %v129_v27   ;;  %260 = vperm.xlu0 %2775, %v91_v28  }
  0x7a   :  { %491 = vperm.xlu1 %2776, %v130_v30   ;;  %263 = vperm.xlu0 %2775, %v92_v31  }
  0x7d   :  { %v177_v35 = vpop.permute.xlu1 %176  ;;  %v174_v36 = vpop.permute.xlu0 %173 }
  0x7e   :  { %vm287_vm0 = vcmp.eq.s32.totalorder %v3264_v32, %v177_v35  ;;  %494 = vperm.xlu1 %2776, %v131_v33   ;;  %266 = vperm.xlu0 %2775, %v93_v34   ;;  %vm286_vm1 = vcmp.eq.s32.totalorder %v3264_v32, %v174_v36 }
  0x7f   :  { %2622 = vmatprep.mubr.msk.f32.mxu0 %vm286_vm1, %v2952_v37 }
  0x80   :  { %2623 = vmatmul.mubr.msk.f32.vlgmr.msra.gmra.mxu0 %vm287_vm0, %v2952_v37 }
  0x81   :  { %v405_v40 = vpop.permute.xlu1 %404  ;;  %v402_v41 = vpop.permute.xlu0 %401 }
  0x82   :  { %vm515_vm2 = vcmp.eq.s32.totalorder %v3264_v32, %v405_v40  ;;  %497 = vperm.xlu1 %2776, %v132_v38   ;;  %269 = vperm.xlu0 %2775, %v94_v39   ;;  %vm514_vm3 = vcmp.eq.s32.totalorder %v3264_v32, %v402_v41 }
  0x83   :  { %2711 = vmatprep.mubr.msk.f32.mxu1 %vm514_vm3, %v2952_v37 }
  0x84   :  { %2712 = vmatmul.mubr.msk.f32.vlgmr.msra.gmra.mxu1 %vm515_vm2, %v2952_v37 }
  0x85   :  { %v408_v44 = vpop.permute.xlu1 %407  ;;  %v180_v45 = vpop.permute.xlu0 %179 }
  0x86   :  { %vm516_vm4 = vcmp.eq.s32.totalorder %v3264_v32, %v408_v44  ;;  %vm288_vm5 = vcmp.eq.s32.totalorder %v3264_v32, %v180_v45  ;;  %500 = vperm.xlu1 %2776, %v133_v42   ;;  %272 = vperm.xlu0 %2775, %v95_v43  }
  0x87   :  { %2625 = vmatprep.mubr.msk.f32.mxu0 %vm288_vm5, %v2952_v37  ;;  %2714 = vmatprep.mubr.msk.f32.mxu1 %vm516_vm4, %v2952_v37 }
  0x89   :  { %v411_v48 = vpop.permute.xlu1 %410  ;;  %v183_v49 = vpop.permute.xlu0 %182 }
  0x8a   :  { %vm517_vm6 = vcmp.eq.s32.totalorder %v3264_v32, %v411_v48  ;;  %vm289_vm7 = vcmp.eq.s32.totalorder %v3264_v32, %v183_v49  ;;  %503 = vperm.xlu1 %2776, %v134_v46   ;;  %275 = vperm.xlu0 %2775, %v96_v47  }
  0x8b   :  { %2626 = vmatmul.mubr.msk.f32.gmra.mxu0 %vm289_vm7, %v2952_v37  ;;  %2715 = vmatmul.mubr.msk.f32.gmra.mxu1 %vm517_vm6, %v2952_v37 }
  0x8d   :  { %v414_v52 = vpop.permute.xlu1 %413  ;;  %v186_v53 = vpop.permute.xlu0 %185 }
  0x8e   :  { %vm518_vm8 = vcmp.eq.s32.totalorder %v3264_v32, %v414_v52  ;;  %vm290_vm9 = vcmp.eq.s32.totalorder %v3264_v32, %v186_v53  ;;  %506 = vperm.xlu1 %2776, %v135_v50   ;;  %278 = vperm.xlu0 %2775, %v97_v51  }
  0x8f   :  { %2628 = vmatprep.mubr.msk.f32.mxu0 %vm290_vm9, %v2952_v37  ;;  %2717 = vmatprep.mubr.msk.f32.mxu1 %vm518_vm8, %v2952_v37 }
  0x91   :  { %v417_v56 = vpop.permute.xlu1 %416  ;;  %v189_v57 = vpop.permute.xlu0 %188 }
  0x92   :  { %vm519_vm10 = vcmp.eq.s32.totalorder %v3264_v32, %v417_v56  ;;  %vm291_vm11 = vcmp.eq.s32.totalorder %v3264_v32, %v189_v57  ;;  %509 = vperm.xlu1 %2776, %v136_v54   ;;  %281 = vperm.xlu0 %2775, %v98_v55  }
  0x93   :  { %2629 = vmatmul.mubr.msk.f32.gmra.mxu0 %vm291_vm11, %v2952_v37  ;;  %2718 = vmatmul.mubr.msk.f32.gmra.mxu1 %vm519_vm10, %v2952_v37 }
  0x95   :  { %v420_v60 = vpop.permute.xlu1 %419  ;;  %v192_v61 = vpop.permute.xlu0 %191 }
  0x96   :  { %vm520_vm12 = vcmp.eq.s32.totalorder %v3264_v32, %v420_v60  ;;  %vm292_vm13 = vcmp.eq.s32.totalorder %v3264_v32, %v192_v61  ;;  %512 = vperm.xlu1 %2776, %v137_v58   ;;  %284 = vperm.xlu0 %2775, %v99_v59  }
  0x97   :  { %2631 = vmatprep.mubr.msk.f32.mxu0 %vm292_vm13, %v2952_v37  ;;  %2720 = vmatprep.mubr.msk.f32.mxu1 %vm520_vm12, %v2952_v37 }
  0x99   :  { %v423_v62 = vpop.permute.xlu1 %422  ;;  %v195_v63 = vpop.permute.xlu0 %194 }
  0x9a   :  { %vm521_vm14 = vcmp.eq.s32.totalorder %v3264_v32, %v423_v62  ;;  %vm293_vm15 = vcmp.eq.s32.totalorder %v3264_v32, %v195_v63 }
  0x9b   :  { %2632 = vmatmul.mubr.msk.f32.gmra.mxu0 %vm293_vm15, %v2952_v37  ;;  %2721 = vmatmul.mubr.msk.f32.gmra.mxu1 %vm521_vm14, %v2952_v37 }
  0x9d   :  { %v426_v0 = vpop.permute.xlu1 %425  ;;  %v198_v1 = vpop.permute.xlu0 %197 }
  0x9e   :  { %vm522_vm0 = vcmp.eq.s32.totalorder %v3264_v32, %v426_v0  ;;  %vm294_vm1 = vcmp.eq.s32.totalorder %v3264_v32, %v198_v1 }
  0x9f   :  { %2634 = vmatprep.mubr.msk.f32.mxu0 %vm294_vm1, %v2952_v37  ;;  %2723 = vmatprep.mubr.msk.f32.mxu1 %vm522_vm0, %v2952_v37 }
  0xa1   :  { %v429_v2 = vpop.permute.xlu1 %428  ;;  %v201_v3 = vpop.permute.xlu0 %200 }
  0xa2   :  { %vm523_vm2 = vcmp.eq.s32.totalorder %v3264_v32, %v429_v2  ;;  %vm295_vm3 = vcmp.eq.s32.totalorder %v3264_v32, %v201_v3 }
  0xa3   :  { %2635 = vmatmul.mubr.msk.f32.gmra.mxu0 %vm295_vm3, %v2952_v37  ;;  %2724 = vmatmul.mubr.msk.f32.gmra.mxu1 %vm523_vm2, %v2952_v37 }
  0xa5   :  { %v432_v4 = vpop.permute.xlu1 %431  ;;  %v204_v5 = vpop.permute.xlu0 %203 }
  0xa6   :  { %vm524_vm4 = vcmp.eq.s32.totalorder %v3264_v32, %v432_v4  ;;  %vm296_vm5 = vcmp.eq.s32.totalorder %v3264_v32, %v204_v5 }
  0xa7   :  { %2637 = vmatprep.mubr.msk.f32.mxu0 %vm296_vm5, %v2952_v37  ;;  %2726 = vmatprep.mubr.msk.f32.mxu1 %vm524_vm4, %v2952_v37 }
  0xa9   :  { %v435_v6 = vpop.permute.xlu1 %434  ;;  %v207_v7 = vpop.permute.xlu0 %206 }
  0xaa   :  { %vm525_vm6 = vcmp.eq.s32.totalorder %v3264_v32, %v435_v6  ;;  %vm297_vm7 = vcmp.eq.s32.totalorder %v3264_v32, %v207_v7 }
  0xab   :  { %2638 = vmatmul.mubr.msk.f32.gmra.mxu0 %vm297_vm7, %v2952_v37  ;;  %2727 = vmatmul.mubr.msk.f32.gmra.mxu1 %vm525_vm6, %v2952_v37 }
  0xad   :  { %v438_v8 = vpop.permute.xlu1 %437  ;;  %v210_v9 = vpop.permute.xlu0 %209 }
  0xae   :  { %vm526_vm8 = vcmp.eq.s32.totalorder %v3264_v32, %v438_v8  ;;  %vm298_vm9 = vcmp.eq.s32.totalorder %v3264_v32, %v210_v9 }
  0xaf   :  { %2640 = vmatprep.mubr.msk.f32.mxu0 %vm298_vm9, %v2952_v37  ;;  %2729 = vmatprep.mubr.msk.f32.mxu1 %vm526_vm8, %v2952_v37 }
  0xb1   :  { %v441_v10 = vpop.permute.xlu1 %440  ;;  %v213_v11 = vpop.permute.xlu0 %212 }
  0xb2   :  { %vm527_vm10 = vcmp.eq.s32.totalorder %v3264_v32, %v441_v10  ;;  %vm299_vm11 = vcmp.eq.s32.totalorder %v3264_v32, %v213_v11 }
  0xb3   :  { %2641 = vmatmul.mubr.msk.f32.gmra.mxu0 %vm299_vm11, %v2952_v37  ;;  %2730 = vmatmul.mubr.msk.f32.gmra.mxu1 %vm527_vm10, %v2952_v37 }
  0xb5   :  { %v444_v12 = vpop.permute.xlu1 %443  ;;  %v216_v13 = vpop.permute.xlu0 %215 }
  0xb6   :  { %vm528_vm12 = vcmp.eq.s32.totalorder %v3264_v32, %v444_v12  ;;  %vm300_vm13 = vcmp.eq.s32.totalorder %v3264_v32, %v216_v13 }
  0xb7   :  { %2643 = vmatprep.mubr.msk.f32.mxu0 %vm300_vm13, %v2952_v37  ;;  %2732 = vmatprep.mubr.msk.f32.mxu1 %vm528_vm12, %v2952_v37 }
  0xb9   :  { %v447_v14 = vpop.permute.xlu1 %446  ;;  %v219_v15 = vpop.permute.xlu0 %218 }
  0xba   :  { %vm529_vm14 = vcmp.eq.s32.totalorder %v3264_v32, %v447_v14  ;;  %vm301_vm15 = vcmp.eq.s32.totalorder %v3264_v32, %v219_v15 }
  0xbb   :  { %2644 = vmatmul.mubr.msk.f32.gmra.mxu0 %vm301_vm15, %v2952_v37  ;;  %2733 = vmatmul.mubr.msk.f32.gmra.mxu1 %vm529_vm14, %v2952_v37 }
  0xbd   :  { %v450_v16 = vpop.permute.xlu1 %449  ;;  %v222_v17 = vpop.permute.xlu0 %221 }
  0xbe   :  { %vm530_vm0 = vcmp.eq.s32.totalorder %v3264_v32, %v450_v16  ;;  %vm302_vm1 = vcmp.eq.s32.totalorder %v3264_v32, %v222_v17 }
  0xbf   :  { %2646 = vmatprep.mubr.msk.f32.mxu0 %vm302_vm1, %v2952_v37  ;;  %2735 = vmatprep.mubr.msk.f32.mxu1 %vm530_vm0, %v2952_v37 }
  0xc1   :  { %v453_v18 = vpop.permute.xlu1 %452  ;;  %v225_v19 = vpop.permute.xlu0 %224 }
  0xc2   :  { %vm531_vm2 = vcmp.eq.s32.totalorder %v3264_v32, %v453_v18  ;;  %vm303_vm3 = vcmp.eq.s32.totalorder %v3264_v32, %v225_v19 }
  0xc3   :  { %2647 = vmatmul.mubr.msk.f32.gmra.mxu0 %vm303_vm3, %v2952_v37  ;;  %2736 = vmatmul.mubr.msk.f32.gmra.mxu1 %vm531_vm2, %v2952_v37 }
  0xc5   :  { %v456_v20 = vpop.permute.xlu1 %455  ;;  %v228_v21 = vpop.permute.xlu0 %227 }
  0xc6   :  { %vm532_vm4 = vcmp.eq.s32.totalorder %v3264_v32, %v456_v20  ;;  %vm304_vm5 = vcmp.eq.s32.totalorder %v3264_v32, %v228_v21 }
  0xc7   :  { %2649 = vmatprep.mubr.msk.f32.mxu0 %vm304_vm5, %v2952_v37  ;;  %2738 = vmatprep.mubr.msk.f32.mxu1 %vm532_vm4, %v2952_v37 }
  0xc9   :  { %v459_v22 = vpop.permute.xlu1 %458  ;;  %v231_v23 = vpop.permute.xlu0 %230 }
  0xca   :  { %vm533_vm6 = vcmp.eq.s32.totalorder %v3264_v32, %v459_v22  ;;  %vm305_vm7 = vcmp.eq.s32.totalorder %v3264_v32, %v231_v23 }
  0xcb   :  { %2650 = vmatmul.mubr.msk.f32.gmra.mxu0 %vm305_vm7, %v2952_v37  ;;  %2739 = vmatmul.mubr.msk.f32.gmra.mxu1 %vm533_vm6, %v2952_v37 }
  0xcd   :  { %v462_v24 = vpop.permute.xlu1 %461  ;;  %v234_v25 = vpop.permute.xlu0 %233 }
  0xce   :  { %vm534_vm8 = vcmp.eq.s32.totalorder %v3264_v32, %v462_v24  ;;  %vm306_vm9 = vcmp.eq.s32.totalorder %v3264_v32, %v234_v25 }
  0xcf   :  { %2652 = vmatprep.mubr.msk.f32.mxu0 %vm306_vm9, %v2952_v37  ;;  %2741 = vmatprep.mubr.msk.f32.mxu1 %vm534_vm8, %v2952_v37 }
  0xd1   :  { %v465_v26 = vpop.permute.xlu1 %464  ;;  %v237_v27 = vpop.permute.xlu0 %236 }
  0xd2   :  { %vm535_vm10 = vcmp.eq.s32.totalorder %v3264_v32, %v465_v26  ;;  %vm307_vm11 = vcmp.eq.s32.totalorder %v3264_v32, %v237_v27 }
  0xd3   :  { %2653 = vmatmul.mubr.msk.f32.gmra.mxu0 %vm307_vm11, %v2952_v37  ;;  %2742 = vmatmul.mubr.msk.f32.gmra.mxu1 %vm535_vm10, %v2952_v37 }
  0xd5   :  { %v468_v28 = vpop.permute.xlu1 %467  ;;  %v240_v30 = vpop.permute.xlu0 %239 }
  0xd6   :  { %vm536_vm12 = vcmp.eq.s32.totalorder %v3264_v32, %v468_v28  ;;  %vm308_vm13 = vcmp.eq.s32.totalorder %v3264_v32, %v240_v30 }
  0xd7   :  { %2655 = vmatprep.mubr.msk.f32.mxu0 %vm308_vm13, %v2952_v37  ;;  %2744 = vmatprep.mubr.msk.f32.mxu1 %vm536_vm12, %v2952_v37 }
  0xd9   :  { %v471_v31 = vpop.permute.xlu1 %470  ;;  %v243_v33 = vpop.permute.xlu0 %242 }
  0xda   :  { %vm537_vm14 = vcmp.eq.s32.totalorder %v3264_v32, %v471_v31  ;;  %vm309_vm15 = vcmp.eq.s32.totalorder %v3264_v32, %v243_v33 }
  0xdb   :  { %2656 = vmatmul.mubr.msk.f32.gmra.mxu0 %vm309_vm15, %v2952_v37  ;;  %2745 = vmatmul.mubr.msk.f32.gmra.mxu1 %vm537_vm14, %v2952_v37 }
  0xdd   :  { %v474_v34 = vpop.permute.xlu1 %473  ;;  %v246_v35 = vpop.permute.xlu0 %245 }
  0xde   :  { %vm538_vm0 = vcmp.eq.s32.totalorder %v3264_v32, %v474_v34  ;;  %vm310_vm1 = vcmp.eq.s32.totalorder %v3264_v32, %v246_v35 }
  0xdf   :  { %2658 = vmatprep.mubr.msk.f32.mxu0 %vm310_vm1, %v2952_v37  ;;  %2747 = vmatprep.mubr.msk.f32.mxu1 %vm538_vm0, %v2952_v37 }
  0xe1   :  { %v477_v36 = vpop.permute.xlu1 %476  ;;  %v249_v38 = vpop.permute.xlu0 %248 }
  0xe2   :  { %vm539_vm2 = vcmp.eq.s32.totalorder %v3264_v32, %v477_v36  ;;  %vm311_vm3 = vcmp.eq.s32.totalorder %v3264_v32, %v249_v38 }
  0xe3   :  { %2659 = vmatmul.mubr.msk.f32.gmra.mxu0 %vm311_vm3, %v2952_v37  ;;  %2748 = vmatmul.mubr.msk.f32.gmra.mxu1 %vm539_vm2, %v2952_v37 }
  0xe5   :  { %v480_v39 = vpop.permute.xlu1 %479  ;;  %v252_v40 = vpop.permute.xlu0 %251 }
  0xe6   :  { %vm540_vm4 = vcmp.eq.s32.totalorder %v3264_v32, %v480_v39  ;;  %vm312_vm5 = vcmp.eq.s32.totalorder %v3264_v32, %v252_v40 }
  0xe7   :  { %2661 = vmatprep.mubr.msk.f32.mxu0 %vm312_vm5, %v2952_v37  ;;  %2750 = vmatprep.mubr.msk.f32.mxu1 %vm540_vm4, %v2952_v37 }
  0xe9   :  { %v483_v41 = vpop.permute.xlu1 %482  ;;  %v255_v42 = vpop.permute.xlu0 %254 }
  0xea   :  { %vm541_vm6 = vcmp.eq.s32.totalorder %v3264_v32, %v483_v41  ;;  %vm313_vm7 = vcmp.eq.s32.totalorder %v3264_v32, %v255_v42 }
  0xeb   :  { %2662 = vmatmul.mubr.msk.f32.gmra.mxu0 %vm313_vm7, %v2952_v37  ;;  %2751 = vmatmul.mubr.msk.f32.gmra.mxu1 %vm541_vm6, %v2952_v37 }
  0xed   :  { %v486_v43 = vpop.permute.xlu1 %485  ;;  %v258_v44 = vpop.permute.xlu0 %257 }
  0xee   :  { %vm542_vm8 = vcmp.eq.s32.totalorder %v3264_v32, %v486_v43  ;;  %vm314_vm9 = vcmp.eq.s32.totalorder %v3264_v32, %v258_v44 }
  0xef   :  { %2664 = vmatprep.mubr.msk.f32.mxu0 %vm314_vm9, %v2952_v37  ;;  %2753 = vmatprep.mubr.msk.f32.mxu1 %vm542_vm8, %v2952_v37 }
  0xf1   :  { %v489_v45 = vpop.permute.xlu1 %488  ;;  %v261_v46 = vpop.permute.xlu0 %260 }
  0xf2   :  { %vm543_vm10 = vcmp.eq.s32.totalorder %v3264_v32, %v489_v45  ;;  %vm315_vm11 = vcmp.eq.s32.totalorder %v3264_v32, %v261_v46 }
  0xf3   :  { %2665 = vmatmul.mubr.msk.f32.gmra.mxu0 %vm315_vm11, %v2952_v37  ;;  %2754 = vmatmul.mubr.msk.f32.gmra.mxu1 %vm543_vm10, %v2952_v37 }
  0xf5   :  { %v492_v47 = vpop.permute.xlu1 %491  ;;  %v264_v48 = vpop.permute.xlu0 %263 }
  0xf6   :  { %vm544_vm12 = vcmp.eq.s32.totalorder %v3264_v32, %v492_v47  ;;  %vm316_vm13 = vcmp.eq.s32.totalorder %v3264_v32, %v264_v48 }
  0xf7   :  { %2667 = vmatprep.mubr.msk.f32.mxu0 %vm316_vm13, %v2952_v37  ;;  %2756 = vmatprep.mubr.msk.f32.mxu1 %vm544_vm12, %v2952_v37  ;;  %vm1176_vm12 = vcmask 261120  }
  0xf9   :  { %v495_v49 = vpop.permute.xlu1 %494  ;;  %v267_v50 = vpop.permute.xlu0 %266 }
  0xfa   :  { %vm545_vm14 = vcmp.eq.s32.totalorder %v3264_v32, %v495_v49  ;;  %vm317_vm15 = vcmp.eq.s32.totalorder %v3264_v32, %v267_v50 }
  0xfb   :  { %2668 = vmatmul.mubr.msk.f32.gmra.mxu0 %vm317_vm15, %v2952_v37  ;;  %2757 = vmatmul.mubr.msk.f32.gmra.mxu1 %vm545_vm14, %v2952_v37 }
  0xfd   :  { %v498_v51 = vpop.permute.xlu1 %497  ;;  %v270_v52 = vpop.permute.xlu0 %269 }
  0xfe   :  { %vm546_vm0 = vcmp.eq.s32.totalorder %v3264_v32, %v498_v51  ;;  %vm318_vm1 = vcmp.eq.s32.totalorder %v3264_v32, %v270_v52 }
  0xff   :  { %2670 = vmatprep.mubr.msk.f32.mxu0 %vm318_vm1, %v2952_v37  ;;  %2759 = vmatprep.mubr.msk.f32.mxu1 %vm546_vm0, %v2952_v37  ;;  %vm2207_vm0 = vcmask 7168  }
 0x101   :  { %v501_v53 = vpop.permute.xlu1 %500  ;;  %v273_v54 = vpop.permute.xlu0 %272 }
 0x102   :  { %vm547_vm2 = vcmp.eq.s32.totalorder %v3264_v32, %v501_v53  ;;  %vm319_vm3 = vcmp.eq.s32.totalorder %v3264_v32, %v273_v54 }
 0x103   :  { %2671 = vmatmul.mubr.msk.f32.gmra.mxu0 %vm319_vm3, %v2952_v37  ;;  %2760 = vmatmul.mubr.msk.f32.gmra.mxu1 %vm547_vm2, %v2952_v37 }
 0x105   :  { %v504_v55 = vpop.permute.xlu1 %503  ;;  %v276_v56 = vpop.permute.xlu0 %275 }
 0x106   :  { %vm548_vm4 = vcmp.eq.s32.totalorder %v3264_v32, %v504_v55  ;;  %vm320_vm5 = vcmp.eq.s32.totalorder %v3264_v32, %v276_v56 }
 0x107   :  { %2673 = vmatprep.mubr.msk.f32.mxu0 %vm320_vm5, %v2952_v37  ;;  %2762 = vmatprep.mubr.msk.f32.mxu1 %vm548_vm4, %v2952_v37 }
 0x109   :  { %v507_v57 = vpop.permute.xlu1 %506  ;;  %v279_v58 = vpop.permute.xlu0 %278 }
 0x10a   :  { %vm549_vm6 = vcmp.eq.s32.totalorder %v3264_v32, %v507_v57  ;;  %vm321_vm7 = vcmp.eq.s32.totalorder %v3264_v32, %v279_v58 }
 0x10b   :  { %2674 = vmatmul.mubr.msk.f32.gmra.mxu0 %vm321_vm7, %v2952_v37  ;;  %2763 = vmatmul.mubr.msk.f32.gmra.mxu1 %vm549_vm6, %v2952_v37 }
 0x10d   :  { %v510_v59 = vpop.permute.xlu1 %509  ;;  %v282_v60 = vpop.permute.xlu0 %281 }
 0x10e   :  { %vm550_vm8 = vcmp.eq.s32.totalorder %v3264_v32, %v510_v59  ;;  %vm322_vm9 = vcmp.eq.s32.totalorder %v3264_v32, %v282_v60 }
 0x10f   :  { %2676 = vmatprep.mubr.msk.f32.mxu0 %vm322_vm9, %v2952_v37  ;;  %2765 = vmatprep.mubr.msk.f32.mxu1 %vm550_vm8, %v2952_v37 }
 0x111   :  { %v513_v61 = vpop.permute.xlu1 %512  ;;  %v285_v62 = vpop.permute.xlu0 %284 }
 0x112   :  { %vm551_vm10 = vcmp.eq.s32.totalorder %v3264_v32, %v513_v61  ;;  %vm323_vm11 = vcmp.eq.s32.totalorder %v3264_v32, %v285_v62 }
 0x113   :  { %2677 = vmatmul.mubr.msk.f32.gmra.mxu0 %vm323_vm11, %v2952_v37  ;;  %2766 = vmatmul.mubr.msk.f32.gmra.mxu1 %vm551_vm10, %v2952_v37 }
 0x140   :  { %v2624_v63 = vpop.f32.mrf.mxu0 }
 0x142   :  { %v694_v2 = vpop.f32.mrf.mxu0 }
 0x144   :  { %v2713_v0 = vpop.f32.mrf.mxu1 }
 0x145   :  { %v1139_v1 = vmul.f32 %v2713_v0, %v2624_v63 }
 0x146   :  { %v949_v3 = vpop.f32.mrf.mxu1 }
 0x147   :  { %v1138_v4 = vmul.f32 %v949_v3, %v694_v2  ;;  %v1180_v5 = vsel %vm1176_vm12, %v1139_v1, 0.0 }
 0x148   :  { %1181 = vadd.xlane.f32.xlu1 %v1180_v5 }
 0x149   :  { %v1177_v6 = vsel %vm1176_vm12, %v1138_v4, 0.0 }
 0x14a   :  { %1178 = vadd.xlane.f32.xlu0 %v1177_v6 }
 0x14b   :  { %v2627_v7 = vpop.f32.mrf.mxu0  ;;  %v2716_v8 = vpop.f32.mrf.mxu1 }
 0x14c   :  { %v1141_v32 = vmul.f32 %v2716_v8, %v2627_v7 }
 0x14d   :  { %v704_v9 = vpop.f32.mrf.mxu0  ;;  %v959_v10 = vpop.f32.mrf.mxu1 }
 0x14e   :  { %v1140_v11 = vmul.f32 %v959_v10, %v704_v9  ;;  %v1186_v37 = vsel %vm1176_vm12, %v1141_v32, 0.0 }
 0x14f   :  { %1187 = vadd.xlane.f32.xlu0 %v1186_v37 }
 0x150   :  { %v1183_v12 = vsel %vm1176_vm12, %v1140_v11, 0.0 }
 0x153   :  { %v2719_v13 = vpop.f32.mrf.mxu1  ;;  %1184 = vadd.xlane.f32.xlu0 %v1183_v12  ;;  %v2630_v14 = vpop.f32.mrf.mxu0 }
 0x154   :  { %v1143_v15 = vmul.f32 %v2719_v13, %v2630_v14 }
 0x155   :  { %v714_v16 = vpop.f32.mrf.mxu0  ;;  %v969_v17 = vpop.f32.mrf.mxu1 }
 0x156   :  { %v1142_v18 = vmul.f32 %v969_v17, %v714_v16  ;;  %v1192_v19 = vsel %vm1176_vm12, %v1143_v15, 0.0 }
 0x157   :  { %1193 = vadd.xlane.f32.xlu0 %v1192_v19 }
 0x158   :  { %v1189_v20 = vsel %vm1176_vm12, %v1142_v18, 0.0 }
 0x159   :  { %1190 = vadd.xlane.f32.xlu1 %v1189_v20 }
 0x15b   :  { %v2633_v21 = vpop.f32.mrf.mxu0  ;;  %v2722_v22 = vpop.f32.mrf.mxu1 }
 0x15c   :  { %v1145_v23 = vmul.f32 %v2722_v22, %v2633_v21 }
 0x15d   :  { %v724_v24 = vpop.f32.mrf.mxu0  ;;  %v979_v25 = vpop.f32.mrf.mxu1 }
 0x15e   :  { %v1144_v26 = vmul.f32 %v979_v25, %v724_v24  ;;  %v1198_v27 = vsel %vm1176_vm12, %v1145_v23, 0.0 }
 0x15f   :  { %1199 = vadd.xlane.f32.xlu0 %v1198_v27 }
 0x160   :  { %v1195_v28 = vsel %vm1176_vm12, %v1144_v26, 0.0 }
 0x161   :  { %1196 = vadd.xlane.f32.xlu1 %v1195_v28 }
 0x163   :  { %v2636_v30 = vpop.f32.mrf.mxu0  ;;  %v2725_v31 = vpop.f32.mrf.mxu1 }
 0x164   :  { %v1147_v33 = vmul.f32 %v2725_v31, %v2636_v30 }
 0x165   :  { %v734_v34 = vpop.f32.mrf.mxu0  ;;  %v989_v35 = vpop.f32.mrf.mxu1 }
 0x166   :  { %v1146_v36 = vmul.f32 %v989_v35, %v734_v34  ;;  %v1204_v38 = vsel %vm1176_vm12, %v1147_v33, 0.0 }
 0x167   :  { %1205 = vadd.xlane.f32.xlu0 %v1204_v38 }
 0x168   :  { %v1201_v39 = vsel %vm1176_vm12, %v1146_v36, 0.0 }
 0x169   :  { %1202 = vadd.xlane.f32.xlu1 %v1201_v39 }
 0x16b   :  { %v2639_v40 = vpop.f32.mrf.mxu0  ;;  %v2728_v41 = vpop.f32.mrf.mxu1 }
 0x16c   :  { %v1149_v42 = vmul.f32 %v2728_v41, %v2639_v40 }
 0x16d   :  { %v744_v43 = vpop.f32.mrf.mxu0  ;;  %v999_v44 = vpop.f32.mrf.mxu1 }
 0x16e   :  { %v1148_v45 = vmul.f32 %v999_v44, %v744_v43  ;;  %v1210_v46 = vsel %vm1176_vm12, %v1149_v42, 0.0 }
 0x16f   :  { %1211 = vadd.xlane.f32.xlu0 %v1210_v46 }
 0x170   :  { %v1207_v47 = vsel %vm1176_vm12, %v1148_v45, 0.0 }
 0x171   :  { %1208 = vadd.xlane.f32.xlu1 %v1207_v47 }
 0x173   :  { %v2642_v48 = vpop.f32.mrf.mxu0  ;;  %v2731_v49 = vpop.f32.mrf.mxu1 }
 0x174   :  { %v1151_v50 = vmul.f32 %v2731_v49, %v2642_v48 }
 0x175   :  { %v754_v51 = vpop.f32.mrf.mxu0  ;;  %v1009_v52 = vpop.f32.mrf.mxu1 }
 0x176   :  { %v1150_v53 = vmul.f32 %v1009_v52, %v754_v51  ;;  %v1216_v54 = vsel %vm1176_vm12, %v1151_v50, 0.0 }
 0x177   :  { %1217 = vadd.xlane.f32.xlu0 %v1216_v54 }
 0x178   :  { %v1213_v55 = vsel %vm1176_vm12, %v1150_v53, 0.0 }
 0x179   :  { %1214 = vadd.xlane.f32.xlu1 %v1213_v55 }
 0x17b   :  { %v2645_v56 = vpop.f32.mrf.mxu0  ;;  %v2734_v57 = vpop.f32.mrf.mxu1 }
 0x17c   :  { %v1153_v58 = vmul.f32 %v2734_v57, %v2645_v56 }
 0x17d   :  { %v764_v59 = vpop.f32.mrf.mxu0  ;;  %v1019_v60 = vpop.f32.mrf.mxu1 }
 0x17e   :  { %v1152_v61 = vmul.f32 %v1019_v60, %v764_v59  ;;  %v1222_v62 = vsel %vm1176_vm12, %v1153_v58, 0.0 }
 0x17f   :  { %1223 = vadd.xlane.f32.xlu0 %v1222_v62 }
 0x180   :  { %v1219_v63 = vsel %vm1176_vm12, %v1152_v61, 0.0 }
 0x181   :  { %1220 = vadd.xlane.f32.xlu1 %v1219_v63 }
 0x183   :  { %v2648_v0 = vpop.f32.mrf.mxu0  ;;  %v2737_v1 = vpop.f32.mrf.mxu1 }
 0x184   :  { %v1155_v2 = vmul.f32 %v2737_v1, %v2648_v0 }
 0x185   :  { %v774_v3 = vpop.f32.mrf.mxu0  ;;  %v1029_v4 = vpop.f32.mrf.mxu1 }
 0x186   :  { %v1154_v5 = vmul.f32 %v1029_v4, %v774_v3  ;;  %v1228_v6 = vsel %vm1176_vm12, %v1155_v2, 0.0 }
 0x187   :  { %1229 = vadd.xlane.f32.xlu0 %v1228_v6 }
 0x188   :  { %v1225_v7 = vsel %vm1176_vm12, %v1154_v5, 0.0 }
 0x189   :  { %1226 = vadd.xlane.f32.xlu1 %v1225_v7 }
 0x18b   :  { %v2651_v8 = vpop.f32.mrf.mxu0  ;;  %v2740_v32 = vpop.f32.mrf.mxu1 }
 0x18c   :  { %v1157_v9 = vmul.f32 %v2740_v32, %v2651_v8 }
 0x18d   :  { %v784_v10 = vpop.f32.mrf.mxu0  ;;  %v1039_v11 = vpop.f32.mrf.mxu1 }
 0x18e   :  { %v1156_v37 = vmul.f32 %v1039_v11, %v784_v10  ;;  %v1234_v12 = vsel %vm1176_vm12, %v1157_v9, 0.0 }
 0x18f   :  { %1235 = vadd.xlane.f32.xlu0 %v1234_v12 }
 0x190   :  { %v1231_v13 = vsel %vm1176_vm12, %v1156_v37, 0.0 }
 0x191   :  { %1232 = vadd.xlane.f32.xlu1 %v1231_v13 }
 0x193   :  { %v2654_v14 = vpop.f32.mrf.mxu0  ;;  %v2743_v15 = vpop.f32.mrf.mxu1 }
 0x194   :  { %v1159_v16 = vmul.f32 %v2743_v15, %v2654_v14 }
 0x195   :  { %v794_v17 = vpop.f32.mrf.mxu0  ;;  %v1049_v18 = vpop.f32.mrf.mxu1 }
 0x196   :  { %v1158_v19 = vmul.f32 %v1049_v18, %v794_v17  ;;  %v1240_v20 = vsel %vm1176_vm12, %v1159_v16, 0.0 }
 0x197   :  { %1241 = vadd.xlane.f32.xlu0 %v1240_v20 }
 0x198   :  { %v1237_v21 = vsel %vm1176_vm12, %v1158_v19, 0.0 }
 0x199   :  { %1238 = vadd.xlane.f32.xlu1 %v1237_v21 }
 0x19b   :  { %v2657_v22 = vpop.f32.mrf.mxu0  ;;  %v2746_v23 = vpop.f32.mrf.mxu1 }
 0x19c   :  { %v1161_v24 = vmul.f32 %v2746_v23, %v2657_v22 }
 0x19d   :  { %v804_v25 = vpop.f32.mrf.mxu0  ;;  %v1059_v26 = vpop.f32.mrf.mxu1 }
 0x19e   :  { %v1160_v27 = vmul.f32 %v1059_v26, %v804_v25  ;;  %v1246_v28 = vsel %vm1176_vm12, %v1161_v24, 0.0 }
 0x19f   :  { %1247 = vadd.xlane.f32.xlu0 %v1246_v28 }
 0x1a0   :  { %v1243_v30 = vsel %vm1176_vm12, %v1160_v27, 0.0 }
 0x1a1   :  { %1244 = vadd.xlane.f32.xlu1 %v1243_v30 }
 0x1a3   :  { %v2660_v31 = vpop.f32.mrf.mxu0  ;;  %v2749_v33 = vpop.f32.mrf.mxu1 }
 0x1a4   :  { %v1163_v34 = vmul.f32 %v2749_v33, %v2660_v31 }
 0x1a5   :  { %v814_v35 = vpop.f32.mrf.mxu0  ;;  %v1069_v36 = vpop.f32.mrf.mxu1 }
 0x1a6   :  { %v1162_v38 = vmul.f32 %v1069_v36, %v814_v35  ;;  %v1252_v39 = vsel %vm1176_vm12, %v1163_v34, 0.0 }
 0x1a7   :  { %1253 = vadd.xlane.f32.xlu0 %v1252_v39 }
 0x1a8   :  { %v1249_v40 = vsel %vm1176_vm12, %v1162_v38, 0.0 }
 0x1a9   :  { %1250 = vadd.xlane.f32.xlu1 %v1249_v40 }
 0x1ab   :  { %v2663_v41 = vpop.f32.mrf.mxu0  ;;  %v2752_v42 = vpop.f32.mrf.mxu1 }
 0x1ac   :  { %v1165_v43 = vmul.f32 %v2752_v42, %v2663_v41 }
 0x1ad   :  { %v824_v44 = vpop.f32.mrf.mxu0  ;;  %v1079_v45 = vpop.f32.mrf.mxu1 }
 0x1ae   :  { %v1164_v46 = vmul.f32 %v1079_v45, %v824_v44  ;;  %v1258_v47 = vsel %vm1176_vm12, %v1165_v43, 0.0 }
 0x1af   :  { %1259 = vadd.xlane.f32.xlu0 %v1258_v47 }
 0x1b0   :  { %v1255_v48 = vsel %vm1176_vm12, %v1164_v46, 0.0 }
 0x1b1   :  { %1256 = vadd.xlane.f32.xlu1 %v1255_v48 }
 0x1b3   :  { %v2666_v49 = vpop.f32.mrf.mxu0  ;;  %v2755_v50 = vpop.f32.mrf.mxu1 }
 0x1b4   :  { %v1167_v51 = vmul.f32 %v2755_v50, %v2666_v49 }
 0x1b5   :  { %v834_v52 = vpop.f32.mrf.mxu0  ;;  %v1089_v53 = vpop.f32.mrf.mxu1 }
 0x1b6   :  { %v1166_v54 = vmul.f32 %v1089_v53, %v834_v52  ;;  %v1264_v55 = vsel %vm1176_vm12, %v1167_v51, 0.0 }
 0x1b7   :  { %1265 = vadd.xlane.f32.xlu0 %v1264_v55 }
 0x1b8   :  { %v1261_v56 = vsel %vm1176_vm12, %v1166_v54, 0.0 }
 0x1b9   :  { %1262 = vadd.xlane.f32.xlu1 %v1261_v56 }
 0x1bb   :  { %v2669_v57 = vpop.f32.mrf.mxu0  ;;  %v2758_v58 = vpop.f32.mrf.mxu1 }
 0x1bc   :  { %v1169_v59 = vmul.f32 %v2758_v58, %v2669_v57 }
 0x1bd   :  { %v844_v60 = vpop.f32.mrf.mxu0  ;;  %v1099_v61 = vpop.f32.mrf.mxu1 }
 0x1be   :  { %v1168_v62 = vmul.f32 %v1099_v61, %v844_v60  ;;  %v1270_v63 = vsel %vm1176_vm12, %v1169_v59, 0.0 }
 0x1bf   :  { %1271 = vadd.xlane.f32.xlu0 %v1270_v63 }
 0x1c0   :  { %v1267_v0 = vsel %vm1176_vm12, %v1168_v62, 0.0 }
 0x1c1   :  { %1268 = vadd.xlane.f32.xlu1 %v1267_v0  ;;  %v3531_v0 = vshrl.u32 %v170_v29, 7 }
 0x1c3   :  { %v2672_v1 = vpop.f32.mrf.mxu0  ;;  %v2761_v2 = vpop.f32.mrf.mxu1 }
 0x1c4   :  { %v1171_v3 = vmul.f32 %v2761_v2, %v2672_v1 }
 0x1c5   :  { %v854_v4 = vpop.f32.mrf.mxu0  ;;  %v1109_v5 = vpop.f32.mrf.mxu1 }
 0x1c6   :  { %v1170_v6 = vmul.f32 %v1109_v5, %v854_v4  ;;  %v1276_v7 = vsel %vm1176_vm12, %v1171_v3, 0.0 }
 0x1c7   :  { %1277 = vadd.xlane.f32.xlu0 %v1276_v7  ;;  %v1312_v7 = vadd.s32 144, %v3531_v0 }
 0x1c8   :  { %v1273_v8 = vsel %vm1176_vm12, %v1170_v6, 0.0 }
 0x1c9   :  { %1274 = vadd.xlane.f32.xlu1 %v1273_v8  ;;  %vm1389_vm13 = vcmp.lt.s32.totalorder %v1312_v7, 150 }
 0x1cb   :  { %v2675_v32 = vpop.f32.mrf.mxu0  ;;  %v2764_v9 = vpop.f32.mrf.mxu1 }
 0x1cc   :  { %v1173_v10 = vmul.f32 %v2764_v9, %v2675_v32 }
 0x1cd   :  { %v864_v11 = vpop.f32.mrf.mxu0  ;;  %v1119_v37 = vpop.f32.mrf.mxu1 }
 0x1ce   :  { %v1172_v12 = vmul.f32 %v1119_v37, %v864_v11  ;;  %v1282_v13 = vsel %vm1176_vm12, %v1173_v10, 0.0 }
 0x1cf   :  { %1283 = vadd.xlane.f32.xlu0 %v1282_v13 }
 0x1d0   :  { %v1279_v14 = vsel %vm1176_vm12, %v1172_v12, 0.0 }
 0x1d1   :  { %1280 = vadd.xlane.f32.xlu1 %v1279_v14  ;;  %v3498_v21 = vpop.xlane.xlu1 %1181 }
 0x1d2   :  { %v1638_v26 = vand.u32 2147483647, %v3498_v21 }
 0x1d3   :  { %v2678_v15 = vpop.f32.mrf.mxu0  ;;  %v2767_v16 = vpop.f32.mrf.mxu1 }
 0x1d4   :  { %v1175_v17 = vmul.f32 %v2767_v16, %v2678_v15  ;;  %v3496_v18 = vpop.xlane.xlu0 %1178  ;;  %v1676_v28 = vsub.f32 0.0, %v1638_v26 }
 0x1d5   :  { %v874_v19 = vpop.f32.mrf.mxu0  ;;  %v1129_v20 = vpop.f32.mrf.mxu1  ;;  %v1637_v27 = vand.u32 2147483647, %v3496_v18 }
 0x1d6   :  { %v1174_v22 = vmul.f32 %v1129_v20, %v874_v19  ;;  %v1288_v23 = vsel %vm1176_vm12, %v1175_v17, 0.0  ;;  %v1715_v35 = vmul.f32 1.442695, %v1676_v28  ;;  %v2953_v19 = vmov -1.0  }
 0x1d7   :  { %1289 = vadd.xlane.f32.xlu0 %v1288_v23  ;;  %v1675_v31 = vsub.f32 0.0, %v1637_v27  ;;  %v3551_v20 = vsel %vm1389_vm13, 1.0, %v2953_v19 }
 0x1d8   :  { %v3501_v24 = vpop.xlane.xlu0 %1187  ;;  %v1285_v25 = vsel %vm1176_vm12, %v1174_v22, 0.0  ;;  %2777 = vpow2.f32 %v1715_v35 }
 0x1d9   :  { %1286 = vadd.xlane.f32.xlu1 %v1285_v25  ;;  %v1640_v33 = vand.u32 2147483647, %v3501_v24  ;;  %v1713_v36 = vmul.f32 1.442695, %v1675_v31  ;;  %v1600_v31 = vmin.f32 %v3498_v21, 0.0 }
 0x1db   :  { %v1678_v38 = vsub.f32 0.0, %v1640_v33  ;;  %2779 = vpow2.f32 %v1713_v36  ;;  %v1599_v33 = vmin.f32 %v3496_v18, 0.0 }
 0x1dc   :  { %v3506_v30 = vpop.xlane.xlu0 %1184 }
 0x1dd   :  { %v1639_v34 = vand.u32 2147483647, %v3506_v30  ;;  %v1719_v42 = vmul.f32 1.442695, %v1678_v38  ;;  %v1601_v35 = vmin.f32 %v3506_v30, 0.0 }
 0x1df   :  { %v1677_v39 = vsub.f32 0.0, %v1639_v34  ;;  %2781 = vpow2.f32 %v1719_v42  ;;  %v1602_v34 = vmin.f32 %v3501_v24, 0.0 }
 0x1e0   :  { %v3510_v40 = vpop.xlane.xlu0 %1193 }
 0x1e1   :  { %v1642_v43 = vand.u32 2147483647, %v3510_v40  ;;  %v1717_v44 = vmul.f32 1.442695, %v1677_v39  ;;  %v1604_v42 = vmin.f32 %v3510_v40, 0.0 }
 0x1e2   :  { %v3512_v41 = vpop.xlane.xlu1 %1190 }
 0x1e3   :  { %v1641_v45 = vand.u32 2147483647, %v3512_v41  ;;  %v1680_v46 = vsub.f32 0.0, %v1642_v43  ;;  %2783 = vpow2.f32 %v1717_v44  ;;  %v1603_v43 = vmin.f32 %v3512_v41, 0.0 }
 0x1e5   :  { %v1679_v48 = vsub.f32 0.0, %v1641_v45  ;;  %v1723_v51 = vmul.f32 1.442695, %v1680_v46  ;;  %v2778_v54 = vpop.eup %2777 }
 0x1e6   :  { %v1798_v59 = vadd.f32 1.0, %v2778_v54  ;;  %v1801_v9 = vmul.f32 -0.5, %v2778_v54  ;;  %v1804_v16 = vand.u32 2147483647, %v2778_v54 }
 0x1e7   :  { %v1721_v52 = vmul.f32 1.442695, %v1679_v48  ;;  %2785 = vpow2.f32 %v1723_v51 }
 0x1e8   :  { %v3516_v47 = vpop.xlane.xlu0 %1199  ;;  %v3522_v56 = vpop.eup %2779  ;;  %v1802_v15 = vadd.f32 1.0, %v1801_v9  ;;  %vm3562_vm14 = vcmp.lt.f32.partialorder %v1804_v16, 0.0004427343 }
 0x1e9   :  { %v1644_v50 = vand.u32 2147483647, %v3516_v47  ;;  %2787 = vpow2.f32 %v1721_v52  ;;  %v1789_v62 = vadd.f32 1.0, %v3522_v56  ;;  %v1792_v17 = vmul.f32 -0.5, %v3522_v56 }
 0x1ea   :  { %v3518_v49 = vpop.xlane.xlu1 %1196  ;;  %2789 = vlog2.f32 %v1798_v59  ;;  %v1795_v22 = vand.u32 2147483647, %v3522_v56  ;;  %v1803_v38 = vmul.f32 %v2778_v54, %v1802_v15 }
 0x1eb   :  { %v1643_v53 = vand.u32 2147483647, %v3518_v49  ;;  %v1682_v55 = vsub.f32 0.0, %v1644_v50  ;;  %v1793_v21 = vadd.f32 1.0, %v1792_v17 }
 0x1ec   :  { %v3533_v1 = vpop.eup %2781  ;;  %vm3575_vm15 = vcmp.lt.f32.partialorder %v1795_v22, 0.0004427343 }
 0x1ed   :  { %v1681_v57 = vsub.f32 0.0, %v1643_v53  ;;  %v1727_v61 = vmul.f32 1.442695, %v1682_v55  ;;  %v1816_v5 = vadd.f32 1.0, %v3533_v1  ;;  %v1819_v26 = vmul.f32 -0.5, %v3533_v1 }
 0x1ee   :  { %v1822_v46 = vand.u32 2147483647, %v3533_v1  ;;  %v1794_v7 = vmul.f32 %v3522_v56, %v1793_v21 }
 0x1ef   :  { %v1725_v2 = vmul.f32 1.442695, %v1681_v57  ;;  %2791 = vpow2.f32 %v1727_v61  ;;  %v1820_v53 = vadd.f32 1.0, %v1819_v26  ;;  %v1606_v61 = vmin.f32 %v3516_v47, 0.0 }
 0x1f0   :  { %v3526_v60 = vpop.xlane.xlu0 %1205  ;;  %v3536_v4 = vpop.eup %2783  ;;  %2793 = vlog2.f32 %v1789_v62  ;;  %vm3589_vm1 = vcmp.lt.f32.partialorder %v1822_v46, 0.0004427343 }
 0x1f1   :  { %v1646_v3 = vand.u32 2147483647, %v3526_v60  ;;  %v1807_v8 = vadd.f32 1.0, %v3536_v4  ;;  %2795 = vpow2.f32 %v1725_v2  ;;  %v1810_v57 = vmul.f32 -0.5, %v3536_v4 }
 0x1f2   :  { %v3524_v58 = vpop.xlane.xlu1 %1202  ;;  %2797 = vlog2.f32 %v1816_v5  ;;  %v1813_v59 = vand.u32 2147483647, %v3536_v4 }
 0x1f3   :  { %v1645_v63 = vand.u32 2147483647, %v3524_v58  ;;  %v1684_v29 = vsub.f32 0.0, %v1646_v3  ;;  %2799 = vlog2.f32 %v1807_v8  ;;  %v1605_v3 = vmin.f32 %v3518_v49, 0.0 }
 0x1f4   :  { %v3543_v11 = vpop.eup %2785  ;;  %v1811_v16 = vadd.f32 1.0, %v1810_v57  ;;  %vm3596_vm2 = vcmp.lt.f32.partialorder %v1813_v59, 0.0004427343 }
 0x1f5   :  { %v1683_v6 = vsub.f32 0.0, %v1645_v63  ;;  %v1731_v37 = vmul.f32 1.442695, %v1684_v29  ;;  %v1834_v23 = vadd.f32 1.0, %v3543_v11  ;;  %v1837_v56 = vmul.f32 -0.5, %v3543_v11 }
 0x1f6   :  { %v3548_v14 = vpop.eup %2787 }
 0x1f7   :  { %v1729_v10 = vmul.f32 1.442695, %v1683_v6  ;;  %v1825_v27 = vadd.f32 1.0, %v3548_v14  ;;  %v2790_v36 = vpop.eup %2789  ;;  %v1831_v46 = vand.u32 2147483647, %v3548_v14  ;;  %v1838_v57 = vadd.f32 1.0, %v1837_v56 }
 0x1f8   :  { %v3545_v12 = vpop.xlane.xlu0 %1211  ;;  %v1800_v63 = vmul.f32 0.6931472, %v2790_v36 }
 0x1f9   :  { %2801 = vpow2.f32 %v1729_v10  ;;  %v1648_v25 = vand.u32 2147483647, %v3545_v12  ;;  %v1821_v10 = vmul.f32 %v3533_v1, %v1820_v53  ;;  %vm3631_vm4 = vcmp.lt.f32.partialorder %v1831_v46, 0.0004427343 }
 0x1fa   :  { %v3541_v32 = vpop.xlane.xlu1 %1208  ;;  %2803 = vpow2.f32 %v1731_v37  ;;  %v1806_v22 = vsel %vm3562_vm14, %v1803_v38, %v1800_v63  ;;  %v1607_v38 = vmin.f32 %v3524_v58, 0.0  ;;  %v1610_v8 = vmin.f32 %v3545_v12, 0.0 }
 0x1fb   :  { %v1647_v13 = vand.u32 2147483647, %v3541_v32  ;;  %2805 = vlog2.f32 %v1834_v23  ;;  %v1686_v48 = vsub.f32 0.0, %v1648_v25  ;;  %v1840_v23 = vand.u32 2147483647, %v3543_v11 }
 0x1fc   :  { %v3570_v45 = vpop.eup %2791  ;;  %2807 = vlog2.f32 %v1825_v27 }
 0x1fd   :  { %v1685_v28 = vsub.f32 0.0, %v1647_v13  ;;  %v2794_v51 = vpop.eup %2793  ;;  %v1852_v2 = vadd.f32 1.0, %v3570_v45  ;;  %v1735_v29 = vmul.f32 1.442695, %v1686_v48  ;;  %v1608_v13 = vmin.f32 %v3526_v60, 0.0 }
 0x1fe   :  { %v3579_v55 = vpop.eup %2795  ;;  %v1791_v6 = vmul.f32 0.6931472, %v2794_v51  ;;  %v2132_v48 = vsub.f32 %v1600_v31, %v1806_v22  ;;  %v1812_v51 = vmul.f32 %v3536_v4, %v1811_v16  ;;  %vm3619_vm3 = vcmp.lt.f32.partialorder %v1840_v23, 0.0004427343 }
 0x1ff   :  { %v1733_v54 = vmul.f32 1.442695, %v1685_v28  ;;  %v2798_v9 = vpop.eup %2797  ;;  %v1843_v37 = vadd.f32 1.0, %v3579_v55  ;;  %v1828_v28 = vmul.f32 -0.5, %v3548_v14  ;;  %v1855_v31 = vmul.f32 -0.5, %v3570_v45 }
 0x200   :  { %v3573_v50 = vpop.xlane.xlu0 %1217  ;;  %v2800_v15 = vpop.eup %2799  ;;  %v1797_v26 = vsel %vm3575_vm15, %v1794_v7, %v1791_v6  ;;  %v1818_v27 = vmul.f32 0.6931472, %v2798_v9  ;;  %v2209_v9 = vsel %vm2207_vm0, %v2132_v48, 0.0  ;;  %v1858_v17 = vand.u32 2147483647, %v3570_v45 }
 0x201   :  { %v1650_v5 = vand.u32 2147483647, %v3573_v50  ;;  %2809 = vpow2.f32 %v1733_v54  ;;  %v1809_v21 = vmul.f32 0.6931472, %v2800_v15  ;;  %v2131_v54 = vsub.f32 %v1599_v33, %v1797_v26 }
 0x202   :  { %v3568_v44 = vpop.xlane.xlu1 %1214  ;;  %2811 = vlog2.f32 %v1852_v2  ;;  %v1824_v63 = vsel %vm3589_vm1, %v1821_v10, %v1818_v27  ;;  %v1829_v2 = vadd.f32 1.0, %v1828_v28  ;;  %v1609_v10 = vmin.f32 %v3541_v32, 0.0 }
 0x203   :  { %v1649_v62 = vand.u32 2147483647, %v3568_v44  ;;  %v1688_v1 = vsub.f32 0.0, %v1650_v5  ;;  %2813 = vpow2.f32 %v1735_v29  ;;  %v1815_v18 = vsel %vm3596_vm2, %v1812_v51, %v1809_v21 }
 0x204   :  { %2815 = vlog2.f32 %v1843_v37  ;;  %v2208_v15 = vsel %vm2207_vm0, %v2131_v54, 0.0  ;;  %v2134_v16 = vsub.f32 %v1602_v34, %v1824_v63  ;;  %v1856_v23 = vadd.f32 1.0, %v1855_v31 }
 0x205   :  { %v1687_v19 = vsub.f32 0.0, %v1649_v62  ;;  %v1739_v62 = vmul.f32 1.442695, %v1688_v1  ;;  %v1846_v27 = vmul.f32 -0.5, %v3579_v55  ;;  %v1839_v28 = vmul.f32 %v3543_v11, %v1838_v57 }
 0x206   :  { %v3609_v36 = vpop.eup %2801  ;;  %v1849_v21 = vand.u32 2147483647, %v3579_v55  ;;  %v1830_v48 = vmul.f32 %v3548_v14, %v1829_v2  ;;  %v2213_v54 = vsel %vm2207_vm0, %v2134_v16, 0.0  ;;  %vm3663_vm5 = vcmp.lt.f32.partialorder %v1858_v17, 0.0004427343 }
 0x207   :  { %v3613_v39 = vpop.eup %2803  ;;  %v1737_v53 = vmul.f32 1.442695, %v1687_v19  ;;  %v1861_v4 = vadd.f32 1.0, %v3609_v36  ;;  %v2133_v19 = vsub.f32 %v1601_v35, %v1815_v18  ;;  %v2210_v35 = vadd.f32 %v2209_v9, %v2208_v15 }
 0x208   :  { %v3627_v5 = vpop.xlane.xlu0 %1223  ;;  %v2806_v6 = vpop.eup %2805  ;;  %v1870_v7 = vadd.f32 1.0, %v3613_v39  ;;  %v1873_v51 = vmul.f32 -0.5, %v3613_v39  ;;  %v1857_v2 = vmul.f32 %v3570_v45, %v1856_v23  ;;  %v1847_v18 = vadd.f32 1.0, %v1846_v27 }
 0x209   :  { %v2808_v29 = vpop.eup %2807  ;;  %2817 = vpow2.f32 %v1737_v53  ;;  %v1836_v22 = vmul.f32 0.6931472, %v2806_v6  ;;  %v1652_v24 = vand.u32 2147483647, %v3627_v5  ;;  %vm3673_vm6 = vcmp.lt.f32.partialorder %v1849_v21, 0.0004427343 }
 0x20a   :  { %v3604_v25 = vpop.xlane.xlu1 %1220  ;;  %2819 = vpow2.f32 %v1739_v62  ;;  %v1827_v26 = vmul.f32 0.6931472, %v2808_v29  ;;  %v2211_v62 = vsel %vm2207_vm0, %v2133_v19, 0.0  ;;  %v1876_v15 = vand.u32 2147483647, %v3613_v39 }
 0x20b   :  { %v1651_v52 = vand.u32 2147483647, %v3604_v25  ;;  %2821 = vlog2.f32 %v1861_v4  ;;  %v1842_v11 = vsel %vm3619_vm3, %v1839_v28, %v1836_v22  ;;  %v1690_v4 = vsub.f32 0.0, %v1652_v24 }
 0x20c   :  { %2823 = vlog2.f32 %v1870_v7  ;;  %v1833_v14 = vsel %vm3631_vm4, %v1830_v48, %v1827_v26  ;;  %v2212_v29 = vadd.f32 %v2211_v62, %v2210_v35  ;;  %v2136_v9 = vsub.f32 %v1604_v42, %v1842_v11 }
 0x20d   :  { %v1689_v37 = vsub.f32 0.0, %v1651_v52  ;;  %v2135_v45 = vsub.f32 %v1603_v43, %v1833_v14  ;;  %v1612_v17 = vmin.f32 %v3573_v50, 0.0  ;;  %v1743_v23 = vmul.f32 1.442695, %v1690_v4 }
 0x20e   :  { %v3651_v34 = vpop.eup %2809  ;;  %v1848_v26 = vmul.f32 %v3579_v55, %v1847_v18  ;;  %v1864_v40 = vmul.f32 -0.5, %v3609_v36  ;;  %v1611_v42 = vmin.f32 %v3568_v44, 0.0  ;;  %v2217_v41 = vsel %vm2207_vm0, %v2136_v9, 0.0 }
 0x20f   :  { %v1741_v46 = vmul.f32 1.442695, %v1689_v37  ;;  %v2812_v52 = vpop.eup %2811  ;;  %v1879_v31 = vadd.f32 1.0, %v3651_v34  ;;  %v1874_v37 = vadd.f32 1.0, %v1873_v51  ;;  %v2214_v43 = vadd.f32 %v2213_v54, %v2212_v29 }
 0x210   :  { %v3647_v1 = vpop.xlane.xlu0 %1229  ;;  %v3667_v63 = vpop.eup %2813  ;;  %v1854_v19 = vmul.f32 0.6931472, %v2812_v52  ;;  %v2215_v35 = vsel %vm2207_vm0, %v2135_v45, 0.0  ;;  %vm3694_vm7 = vcmp.lt.f32.partialorder %v1876_v15, 0.0004427343  ;;  %v1614_v51 = vmin.f32 %v3627_v5, 0.0 }
 0x211   :  { %v1654_v53 = vand.u32 2147483647, %v3647_v1  ;;  %v2816_v6 = vpop.eup %2815  ;;  %2825 = vpow2.f32 %v1741_v46  ;;  %v1888_v16 = vadd.f32 1.0, %v3667_v63  ;;  %v1875_v28 = vmul.f32 %v3613_v39, %v1874_v37 }
 0x212   :  { %v3643_v56 = vpop.xlane.xlu1 %1226  ;;  %v1845_v22 = vmul.f32 0.6931472, %v2816_v6  ;;  %2827 = vlog2.f32 %v1879_v31  ;;  %v1867_v48 = vand.u32 2147483647, %v3609_v36  ;;  %v1860_v39 = vsel %vm3663_vm5, %v1857_v2, %v1854_v19 }
 0x213   :  { %v1653_v30 = vand.u32 2147483647, %v3643_v56  ;;  %v1692_v33 = vsub.f32 0.0, %v1654_v53  ;;  %2829 = vlog2.f32 %v1888_v16  ;;  %v1891_v62 = vmul.f32 -0.5, %v3667_v63 }
 0x214   :  { %v1851_v54 = vsel %vm3673_vm6, %v1848_v26, %v1845_v22  ;;  %2831 = vpow2.f32 %v1743_v23  ;;  %v1865_v14 = vadd.f32 1.0, %v1864_v40  ;;  %v2216_v6 = vadd.f32 %v2215_v35, %v2214_v43 }
 0x215   :  { %v1691_v59 = vsub.f32 0.0, %v1653_v30  ;;  %v1747_v21 = vmul.f32 1.442695, %v1692_v33  ;;  %v2138_v2 = vsub.f32 %v1606_v61, %v1860_v39  ;;  %v2137_v7 = vsub.f32 %v1605_v3, %v1851_v54 }
 0x216   :  { %v3687_v24 = vpop.eup %2817  ;;  %vm3716_vm8 = vcmp.lt.f32.partialorder %v1867_v48, 0.0004427343  ;;  %v1892_v37 = vadd.f32 1.0, %v1891_v62  ;;  %v1882_v33 = vmul.f32 -0.5, %v3651_v34  ;;  %v1613_v45 = vmin.f32 %v3604_v25, 0.0 }
 0x217   :  { %v1745_v27 = vmul.f32 1.442695, %v1691_v59  ;;  %v3691_v30 = vpop.eup %2819  ;;  %v1897_v31 = vadd.f32 1.0, %v3687_v24  ;;  %v1885_v15 = vand.u32 2147483647, %v3651_v34  ;;  %v2218_v3 = vadd.f32 %v2217_v41, %v2216_v6 }
 0x218   :  { %v1236_v46 = vpop.xlane.xlu0 %1235  ;;  %v2822_v52 = vpop.eup %2821  ;;  %v1906_v18 = vadd.f32 1.0, %v3691_v30  ;;  %v1894_v16 = vand.u32 2147483647, %v3667_v63  ;;  %v2221_v23 = vsel %vm2207_vm0, %v2138_v2, 0.0  ;;  %v2219_v26 = vsel %vm2207_vm0, %v2137_v7, 0.0 }
 0x219   :  { %v2824_v11 = vpop.eup %2823  ;;  %2833 = vpow2.f32 %v1745_v27  ;;  %v3706_v4 = vmul.f32 -1.0, %v1236_v46  ;;  %v1863_v59 = vmul.f32 0.6931472, %v2822_v52  ;;  %v1909_v40 = vmul.f32 -0.5, %v3691_v30 }
 0x21a   :  { %v1233_v53 = vpop.xlane.xlu1 %1232  ;;  %2835 = vpow2.f32 %v1747_v21  ;;  %v1872_v9 = vmul.f32 0.6931472, %v2824_v11  ;;  %v3737_v41 = vmul.f32 %v3667_v63, %v1892_v37  ;;  %v1883_v43 = vadd.f32 1.0, %v1882_v33 }
 0x21b   :  { %v3710_v57 = vmul.f32 %v3551_v20, %v1233_v53  ;;  %v1866_v20 = vmul.f32 %v3609_v36, %v1865_v14  ;;  %2837 = vlog2.f32 %v1897_v31  ;;  %v1656_v47 = vand.u32 2147483647, %v3706_v4 }
 0x21c   :  { %2839 = vlog2.f32 %v1906_v18  ;;  %v1878_v27 = vsel %vm3694_vm7, %v1875_v28, %v1872_v9  ;;  %vm3741_vm9 = vcmp.lt.f32.partialorder %v1885_v15, 0.0004427343  ;;  %v2220_v39 = vadd.f32 %v2219_v26, %v2218_v3 }
 0x21d   :  { %v1655_v19 = vand.u32 2147483647, %v3710_v57  ;;  %v1869_v36 = vsel %vm3716_vm8, %v1866_v20, %v1863_v59  ;;  %v1694_v53 = vsub.f32 0.0, %v1656_v47  ;;  %vm3750_vm10 = vcmp.lt.f32.partialorder %v1894_v16, 0.0004427343 }
 0x21e   :  { %v3725_v61 = vpop.eup %2825  ;;  %v2139_v28 = vsub.f32 %v1607_v38, %v1869_v36  ;;  %v1900_v55 = vmul.f32 -0.5, %v3687_v24  ;;  %v2140_v62 = vsub.f32 %v1608_v13, %v1878_v27  ;;  %v1910_v11 = vadd.f32 1.0, %v1909_v40 }
 0x21f   :  { %v2828_v46 = vpop.eup %2827  ;;  %v1915_v48 = vadd.f32 1.0, %v3725_v61  ;;  %v1693_v54 = vsub.f32 0.0, %v1655_v19  ;;  %v1616_v14 = vmin.f32 %v3647_v1, 0.0  ;;  %v1615_v31 = vmin.f32 %v3643_v56, 0.0 }
 0x220   :  { %v1242_v22 = vpop.xlane.xlu0 %1241  ;;  %v2830_v6 = vpop.eup %2829  ;;  %v1881_v18 = vmul.f32 0.6931472, %v2828_v46  ;;  %v1884_v58 = vmul.f32 %v3651_v34, %v1883_v43  ;;  %v1903_v38 = vand.u32 2147483647, %v3687_v24  ;;  %v1912_v29 = vand.u32 2147483647, %v3691_v30 }
 0x221   :  { %v3746_v52 = vmul.f32 -1.0, %v1242_v22  ;;  %v3762_v59 = vpop.eup %2831  ;;  %2841 = vlog2.f32 %v1915_v48  ;;  %v1751_v60 = vmul.f32 1.442695, %v1694_v53  ;;  %v2222_v37 = vadd.f32 %v2221_v23, %v2220_v39 }
 0x222   :  { %v1239_v49 = vpop.xlane.xlu1 %1238  ;;  %v2223_v33 = vsel %vm2207_vm0, %v2139_v28, 0.0  ;;  %v1901_v20 = vadd.f32 1.0, %v1900_v55  ;;  %v1749_v34 = vmul.f32 1.442695, %v1693_v54  ;;  %v2225_v47 = vsel %vm2207_vm0, %v2140_v62, 0.0 }
 0x223   :  { %v3739_v21 = vmul.f32 -1.0, %v1239_v49  ;;  %v1658_v13 = vand.u32 2147483647, %v3746_v52  ;;  %v1890_v49 = vmul.f32 0.6931472, %v2830_v6  ;;  %v1887_v22 = vsel %vm3741_vm9, %v1884_v58, %v1881_v18 }
 0x224   :  { %v1911_v26 = vmul.f32 %v3691_v30, %v1910_v11  ;;  %vm3777_vm11 = vcmp.lt.f32.partialorder %v1903_v38, 0.0004427343  ;;  %v1924_v36 = vadd.f32 1.0, %v3762_v59  ;;  %v2224_v40 = vadd.f32 %v2223_v33, %v2222_v37 }
 0x225   :  { %v1657_v2 = vand.u32 2147483647, %v3739_v21  ;;  %vm3782_vm12 = vcmp.lt.f32.partialorder %v1912_v29, 0.0004427343  ;;  %2843 = vpow2.f32 %v1751_v60  ;;  %v1696_v46 = vsub.f32 0.0, %v1658_v13 }
 0x226   :  { %v3766_v9 = vpop.eup %2833  ;;  %v1902_v53 = vmul.f32 %v3687_v24, %v1901_v20  ;;  %2845 = vpow2.f32 %v1749_v34  ;;  %v1896_v55 = vsel %vm3750_vm10, %v3737_v41, %v1890_v49  ;;  %v2141_v54 = vsub.f32 %v1609_v10, %v1887_v22 }
 0x227   :  { %v3769_v15 = vpop.eup %2835  ;;  %v1695_v3 = vsub.f32 0.0, %v1657_v2  ;;  %v1933_v43 = vadd.f32 1.0, %v3766_v9  ;;  %2847 = vlog2.f32 %v1924_v36  ;;  %v1927_v6 = vmul.f32 -0.5, %v3762_v59 }
 0x228   :  { %v1248_v16 = vpop.xlane.xlu0 %1247  ;;  %v2838_v35 = vpop.eup %2837  ;;  %v1942_v30 = vadd.f32 1.0, %v3769_v15  ;;  %v1618_v24 = vmin.f32 %v3706_v4, 0.0  ;;  %v1918_v38 = vmul.f32 -0.5, %v3725_v61  ;;  %v1755_v2 = vmul.f32 1.442695, %v1696_v46 }
 0x229   :  { %v3789_v39 = vmul.f32 -1.0, %v1248_v16  ;;  %v2840_v28 = vpop.eup %2839  ;;  %v1753_v62 = vmul.f32 1.442695, %v1695_v3  ;;  %v1899_v58 = vmul.f32 0.6931472, %v2838_v35  ;;  %2849 = vlog2.f32 %v1933_v43 }
 0x22a   :  { %v1245_v7 = vpop.xlane.xlu1 %1244  ;;  %v2142_v41 = vsub.f32 %v1610_v8, %v1896_v55  ;;  %v1908_v32 = vmul.f32 0.6931472, %v2840_v28  ;;  %2851 = vlog2.f32 %v1942_v30  ;;  %v2227_v63 = vsel %vm2207_vm0, %v2141_v54, 0.0 }
 0x22b   :  { %v3772_v19 = vmul.f32 -1.0, %v1245_v7  ;;  %v1660_v10 = vand.u32 2147483647, %v3789_v39  ;;  %v1921_v7 = vand.u32 2147483647, %v3725_v61  ;;  %2853 = vpow2.f32 %v1753_v62 }
 0x22c   :  { %v2226_v13 = vadd.f32 %v2225_v47, %v2224_v40  ;;  %v1928_v37 = vadd.f32 1.0, %v1927_v6  ;;  %v1617_v33 = vmin.f32 %v3710_v57, 0.0  ;;  %v1905_v12 = vsel %vm3777_vm11, %v1902_v53, %v1899_v58 }
 0x22d   :  { %v1659_v11 = vand.u32 2147483647, %v3772_v19  ;;  %v1930_v8 = vand.u32 2147483647, %v3762_v59  ;;  %v1919_v34 = vadd.f32 1.0, %v1918_v38  ;;  %2855 = vpow2.f32 %v1755_v2 }
 0x22e   :  { %v2842_v3 = vpop.eup %2841  ;;  %v2228_v16 = vadd.f32 %v2227_v63, %v2226_v13  ;;  %v1914_v22 = vsel %vm3782_vm12, %v1911_v26, %v1908_v32  ;;  %v1698_v36 = vsub.f32 0.0, %v1660_v10  ;;  %v2229_v40 = vsel %vm2207_vm0, %v2142_v41, 0.0 }
 0x22f   :  { %v1697_v29 = vsub.f32 0.0, %v1659_v11  ;;  %vm3817_vm13 = vcmp.lt.f32.partialorder %v1921_v7, 0.0004427343  ;;  %v1945_v23 = vmul.f32 -0.5, %v3769_v15  ;;  %v2143_v35 = vsub.f32 %v1611_v42, %v1905_v12 }
 0x230   :  { %v1254_v60 = vpop.xlane.xlu0 %1253  ;;  %v3825_v53 = vmul.f32 %v3762_v59, %v1928_v37  ;;  %v2144_v30 = vsub.f32 %v1612_v17, %v1914_v22  ;;  %v1917_v28 = vmul.f32 0.6931472, %v2842_v3  ;;  %v1920_v55 = vmul.f32 %v3725_v61, %v1919_v34 }
 0x231   :  { %v3814_v47 = vmul.f32 -1.0, %v1254_v60  ;;  %v1757_v46 = vmul.f32 1.442695, %v1697_v29  ;;  %v1620_v54 = vmin.f32 %v3746_v52, 0.0  ;;  %v2230_v11 = vadd.f32 %v2229_v40, %v2228_v16 }
 0x232   :  { %v1251_v48 = vpop.xlane.xlu1 %1250  ;;  %v3833_v62 = vpop.eup %2843  ;;  %v1759_v6 = vmul.f32 1.442695, %v1698_v36  ;;  %vm3840_vm14 = vcmp.lt.f32.partialorder %v1930_v8, 0.0004427343  ;;  %v1946_v50 = vadd.f32 1.0, %v1945_v23  ;;  %v1936_v61 = vmul.f32 -0.5, %v3766_v9 }
 0x233   :  { %v3799_v18 = vmul.f32 -1.0, %v1251_v48  ;;  %v1662_v44 = vand.u32 2147483647, %v3814_v47  ;;  %v3838_v59 = vpop.eup %2845  ;;  %v1948_v17 = vand.u32 2147483647, %v3769_v15  ;;  %2857 = vpow2.f32 %v1757_v46 }
 0x234   :  { %v2231_v38 = vsel %vm2207_vm0, %v2143_v35, 0.0  ;;  %v1619_v2 = vmin.f32 %v3739_v21, 0.0  ;;  %v2848_v10 = vpop.eup %2847  ;;  %v2233_v63 = vsel %vm2207_vm0, %v2144_v30, 0.0  ;;  %v1923_v7 = vsel %vm3817_vm13, %v1920_v55, %v1917_v28 }
 0x235   :  { %v1661_v20 = vand.u32 2147483647, %v3799_v18  ;;  %v1939_v29 = vand.u32 2147483647, %v3766_v9  ;;  %v1960_v60 = vadd.f32 1.0, %v3833_v62  ;;  %v1951_v37 = vadd.f32 1.0, %v3838_v59 }
 0x236   :  { %v2850_v13 = vpop.eup %2849  ;;  %2859 = vpow2.f32 %v1759_v6  ;;  %v1947_v3 = vmul.f32 %v3769_v15, %v1946_v50  ;;  %vm3857_vm15 = vcmp.lt.f32.partialorder %v1948_v17, 0.0004427343  ;;  %v1937_v22 = vadd.f32 1.0, %v1936_v61 }
 0x237   :  { %v1699_v26 = vsub.f32 0.0, %v1661_v20  ;;  %v1700_v20 = vsub.f32 0.0, %v1662_v44  ;;  %v2852_v34 = vpop.eup %2851  ;;  %v1926_v40 = vmul.f32 0.6931472, %v2848_v10  ;;  %v2145_v43 = vsub.f32 %v1613_v45, %v1923_v7 }
 0x238   :  { %v1260_v48 = vpop.xlane.xlu0 %1259  ;;  %v3861_v36 = vpop.eup %2853  ;;  %v1935_v46 = vmul.f32 0.6931472, %v2850_v13  ;;  %vm3865_vm1 = vcmp.lt.f32.partialorder %v1939_v29, 0.0004427343  ;;  %v1944_v25 = vmul.f32 0.6931472, %v2852_v34  ;;  %v1938_v45 = vmul.f32 %v3766_v9, %v1937_v22 }
 0x239   :  { %v3836_v42 = vmul.f32 -1.0, %v1260_v48  ;;  %v1761_v41 = vmul.f32 1.442695, %v1699_v26  ;;  %v1622_v26 = vmin.f32 %v3789_v39, 0.0  ;;  %v1763_v30 = vmul.f32 1.442695, %v1700_v20 }
 0x23a   :  { %v1257_v49 = vpop.xlane.xlu1 %1256  ;;  %v3871_v35 = vpop.eup %2855  ;;  %v1621_v6 = vmin.f32 %v3772_v19, 0.0  ;;  %v1932_v44 = vsel %vm3840_vm14, %v3825_v53, %v1926_v40  ;;  %v2235_v50 = vsel %vm2207_vm0, %v2145_v43, 0.0  ;;  %v1963_v17 = vmul.f32 -0.5, %v3833_v62 }
 0x23b   :  { %v3827_v27 = vmul.f32 -1.0, %v1257_v49  ;;  %v1664_v12 = vand.u32 2147483647, %v3836_v42  ;;  %v2232_v49 = vadd.f32 %v2231_v38, %v2230_v11  ;;  %2861 = vpow2.f32 %v1761_v41 }
 0x23c   :  { %2863 = vlog2.f32 %v1960_v60  ;;  %v1969_v11 = vadd.f32 1.0, %v3861_v36  ;;  %v1941_v38 = vsel %vm3865_vm1, %v1938_v45, %v1935_v46  ;;  %v1978_v41 = vadd.f32 1.0, %v3871_v35 }
 0x23d   :  { %v1663_v32 = vand.u32 2147483647, %v3827_v27  ;;  %2865 = vlog2.f32 %v1951_v37  ;;  %v1702_v28 = vsub.f32 0.0, %v1664_v12  ;;  %v2234_v10 = vadd.f32 %v2233_v63, %v2232_v49 }
 0x23e   :  { %v1954_v7 = vmul.f32 -0.5, %v3838_v59  ;;  %2867 = vpow2.f32 %v1763_v30  ;;  %v2146_v53 = vsub.f32 %v1614_v51, %v1932_v44  ;;  %v1950_v29 = vsel %vm3857_vm15, %v1947_v3, %v1944_v25 }
 0x23f   :  { %v1701_v23 = vsub.f32 0.0, %v1663_v32  ;;  %v1767_v58 = vmul.f32 1.442695, %v1702_v28  ;;  %v1966_v60 = vand.u32 2147483647, %v3833_v62  ;;  %2869 = vlog2.f32 %v1969_v11 }
 0x240   :  { %v1266_v8 = vpop.xlane.xlu0 %1265  ;;  %v3894_v13 = vpop.eup %2857  ;;  %v2236_v37 = vadd.f32 %v2235_v50, %v2234_v10  ;;  %v2147_v20 = vsub.f32 %v1615_v31, %v1941_v38  ;;  %v1964_v63 = vadd.f32 1.0, %v1963_v17  ;;  %v1957_v12 = vand.u32 2147483647, %v3838_v59 }
 0x241   :  { %v3869_v15 = vmul.f32 -1.0, %v1266_v8  ;;  %v1765_v61 = vmul.f32 1.442695, %v1701_v23  ;;  %v2148_v34 = vsub.f32 %v1616_v14, %v1950_v29  ;;  %v1955_v49 = vadd.f32 1.0, %v1954_v7 }
 0x242   :  { %v1263_v55 = vpop.xlane.xlu1 %1262  ;;  %v1624_v3 = vmin.f32 %v3814_v47, 0.0  ;;  %v2237_v56 = vsel %vm2207_vm0, %v2146_v53, 0.0  ;;  %v1981_v31 = vmul.f32 -0.5, %v3871_v35  ;;  %v1987_v40 = vadd.f32 1.0, %v3894_v13 }
 0x243   :  { %v1666_v9 = vand.u32 2147483647, %v3869_v15  ;;  %v3886_v32 = vmul.f32 -1.0, %v1263_v55  ;;  %2871 = vpow2.f32 %v1765_v61  ;;  %v3903_v22 = vpop.eup %2859  ;;  %v1623_v43 = vmin.f32 %v3799_v18, 0.0 }
 0x244   :  { %2873 = vlog2.f32 %v1978_v41  ;;  %v2238_v23 = vadd.f32 %v2237_v56, %v2236_v37  ;;  %v2239_v46 = vsel %vm2207_vm0, %v2147_v20, 0.0  ;;  %v3911_v1 = vmul.f32 %v3833_v62, %v1964_v63 }
 0x245   :  { %v1704_v8 = vsub.f32 0.0, %v1666_v9  ;;  %v1665_v5 = vand.u32 2147483647, %v3886_v32  ;;  %2875 = vpow2.f32 %v1767_v58  ;;  %vm3917_vm2 = vcmp.lt.f32.partialorder %v1966_v60, 0.0004427343 }
 0x246   :  { %vm3921_vm3 = vcmp.lt.f32.partialorder %v1957_v12, 0.0004427343  ;;  %v1972_v55 = vmul.f32 -0.5, %v3861_v36  ;;  %v2241_v44 = vsel %vm2207_vm0, %v2148_v34, 0.0  ;;  %v1956_v50 = vmul.f32 %v3838_v59, %v1955_v49 }
 0x247   :  { %v1771_v25 = vmul.f32 1.442695, %v1704_v8  ;;  %v1703_v45 = vsub.f32 0.0, %v1665_v5  ;;  %v1984_v17 = vand.u32 2147483647, %v3871_v35  ;;  %v1996_v61 = vadd.f32 1.0, %v3903_v22 }
 0x248   :  { %v1272_v51 = vpop.xlane.xlu0 %1271  ;;  %v3915_v48 = vpop.eup %2861  ;;  %v2240_v41 = vadd.f32 %v2239_v46, %v2238_v23  ;;  %v1982_v9 = vadd.f32 1.0, %v1981_v31  ;;  %v1975_v10 = vand.u32 2147483647, %v3861_v36  ;;  %2877 = vlog2.f32 %v1987_v40 }
 0x249   :  { %v3913_v14 = vmul.f32 -1.0, %v1272_v51  ;;  %v2864_v62 = vpop.eup %2863  ;;  %v1999_v7 = vmul.f32 -0.5, %v3903_v22  ;;  %v2005_v58 = vadd.f32 1.0, %v3915_v48  ;;  %2879 = vpow2.f32 %v1771_v25 }
 0x24a   :  { %v1269_v16 = vpop.xlane.xlu1 %1268  ;;  %v2866_v38 = vpop.eup %2865  ;;  %v1973_v60 = vadd.f32 1.0, %v1972_v55  ;;  %v1990_v59 = vmul.f32 -0.5, %v3894_v13  ;;  %v1769_v37 = vmul.f32 1.442695, %v1703_v45  ;;  %v1962_v63 = vmul.f32 0.6931472, %v2864_v62 }
 0x24b   :  { %v3926_v11 = vmul.f32 -1.0, %v1269_v16  ;;  %v1668_v53 = vand.u32 2147483647, %v3913_v14  ;;  %v1953_v12 = vmul.f32 0.6931472, %v2866_v38  ;;  %2881 = vlog2.f32 %v1996_v61  ;;  %v3939_v5 = vpop.eup %2867 }
 0x24c   :  { %v1626_v8 = vmin.f32 %v3836_v42, 0.0  ;;  %v3941_v51 = vadd.f32 %v2241_v44, %v2240_v41  ;;  %v3944_v34 = vmul.f32 %v3871_v35, %v1982_v9  ;;  %vm3946_vm4 = vcmp.lt.f32.partialorder %v1975_v10, 0.0004427343  ;;  %v2870_v56 = vpop.eup %2869 }
 0x24d   :  { %v1667_v20 = vand.u32 2147483647, %v3926_v11  ;;  %v1625_v16 = vmin.f32 %v3827_v27, 0.0  ;;  %v2000_v31 = vadd.f32 1.0, %v1999_v7  ;;  %v2002_v40 = vand.u32 2147483647, %v3903_v22 }
 0x24e   :  { %2883 = vlog2.f32 %v2005_v58  ;;  %v1706_v23 = vsub.f32 0.0, %v1668_v53  ;;  %vm3954_vm5 = vcmp.lt.f32.partialorder %v1984_v17, 0.0004427343  ;;  %v1974_v35 = vmul.f32 %v3861_v36, %v1973_v60 }
 0x24f   :  { %v1991_v62 = vadd.f32 1.0, %v1990_v59  ;;  %2885 = vpow2.f32 %v1769_v37  ;;  %v1705_v44 = vsub.f32 0.0, %v1667_v20  ;;  %v1968_v38 = vsel %vm3917_vm2, %v3911_v1, %v1962_v63 }
 0x250   :  { %v1278_v29 = vpop.xlane.xlu0 %1277  ;;  %v3952_v25 = vpop.eup %2871  ;;  %v1959_v41 = vsel %vm3921_vm3, %v1956_v50, %v1953_v12  ;;  %v2014_v9 = vadd.f32 1.0, %v3939_v5  ;;  %v1775_v7 = vmul.f32 1.442695, %v1706_v23  ;;  %v1971_v60 = vmul.f32 0.6931472, %v2870_v56 }
 0x251   :  { %v2874_v61 = vpop.eup %2873  ;;  %v3965_v10 = vmul.f32 -1.0, %v1278_v29  ;;  %v1773_v58 = vmul.f32 1.442695, %v1705_v44  ;;  %v3974_v59 = vmul.f32 %v3903_v22, %v2000_v31  ;;  %v1993_v1 = vand.u32 2147483647, %v3894_v13 }
 0x252   :  { %v1275_v46 = vpop.xlane.xlu1 %1274  ;;  %v3967_v17 = vpop.eup %2875  ;;  %v2023_v30 = vadd.f32 1.0, %v3952_v25  ;;  %v2150_v50 = vsub.f32 %v1618_v24, %v1968_v38  ;;  %v2149_v29 = vsub.f32 %v1617_v33, %v1959_v41  ;;  %v1980_v20 = vmul.f32 0.6931472, %v2874_v61 }
 0x253   :  { %v3969_v36 = vmul.f32 -1.0, %v1275_v46  ;;  %2887 = vpow2.f32 %v1773_v58  ;;  %v1670_v37 = vand.u32 2147483647, %v3965_v10  ;;  %v2032_v63 = vadd.f32 1.0, %v3967_v17 }
 0x254   :  { %2889 = vlog2.f32 %v2014_v9  ;;  %v1977_v57 = vsel %vm3946_vm4, %v1974_v35, %v1971_v60  ;;  %vm3990_vm6 = vcmp.lt.f32.partialorder %v1993_v1, 0.0004427343  ;;  %v2243_v46 = vsel %vm2207_vm0, %v2149_v29, 0.0 }
 0x255   :  { %v1669_v22 = vand.u32 2147483647, %v3969_v36  ;;  %2891 = vpow2.f32 %v1775_v7  ;;  %v1708_v12 = vsub.f32 0.0, %v1670_v37  ;;  %v2878_v4 = vpop.eup %2877  ;;  %vm3997_vm7 = vcmp.lt.f32.partialorder %v2002_v40, 0.0004427343 }
 0x256   :  { %2893 = vlog2.f32 %v2023_v30  ;;  %v3994_v23 = vpop.eup %2879  ;;  %v1992_v44 = vmul.f32 %v3894_v13, %v1991_v62  ;;  %v2245_v35 = vsel %vm2207_vm0, %v2150_v50, 0.0  ;;  %v1986_v38 = vsel %vm3954_vm5, %v3944_v34, %v1980_v20 }
 0x257   :  { %v1707_v33 = vsub.f32 0.0, %v1669_v22  ;;  %v1779_v61 = vmul.f32 1.442695, %v1708_v12  ;;  %v2008_v41 = vmul.f32 -0.5, %v3915_v48  ;;  %v1627_v9 = vmin.f32 %v3886_v32, 0.0 }
 0x258   :  { %v1284_v55 = vpop.xlane.xlu0 %1283  ;;  %v2882_v40 = vpop.eup %2881  ;;  %v2151_v58 = vsub.f32 %v1619_v2, %v1977_v57  ;;  %2895 = vlog2.f32 %v2032_v63  ;;  %v2244_v60 = vadd.f32 %v2243_v46, %v3941_v51  ;;  %v1989_v1 = vmul.f32 0.6931472, %v2878_v4 }
 0x259   :  { %v3971_v53 = vmul.f32 -1.0, %v1284_v55  ;;  %v1777_v13 = vmul.f32 1.442695, %v1707_v33  ;;  %v2050_v30 = vadd.f32 1.0, %v3994_v23  ;;  %2897 = vpow2.f32 %v1779_v61 }
 0x25a   :  { %v1281_v28 = vpop.xlane.xlu1 %1280  ;;  %v2017_v34 = vmul.f32 -0.5, %v3939_v5  ;;  %v2152_v21 = vsub.f32 %v1620_v54, %v1986_v38  ;;  %v1998_v2 = vmul.f32 0.6931472, %v2882_v40  ;;  %v2020_v37 = vand.u32 2147483647, %v3939_v5 }
 0x25b   :  { %v1672_v56 = vand.u32 2147483647, %v3971_v53  ;;  %v3986_v31 = vmul.f32 -1.0, %v1281_v28  ;;  %v2884_v45 = vpop.eup %2883  ;;  %2899 = vpow2.f32 %v1777_v13  ;;  %v2009_v51 = vadd.f32 1.0, %v2008_v41 }
 0x25c   :  { %v4016_v29 = vpop.eup %2885  ;;  %v2247_v20 = vsel %vm2207_vm0, %v2151_v58, 0.0  ;;  %v1995_v4 = vsel %vm3990_vm6, %v1992_v44, %v1989_v1  ;;  %v2011_v57 = vand.u32 2147483647, %v3915_v48  ;;  %2901 = vlog2.f32 %v2050_v30 }
 0x25d   :  { %v1671_v49 = vand.u32 2147483647, %v3986_v31  ;;  %v1710_v62 = vsub.f32 0.0, %v1672_v56  ;;  %v2041_v63 = vadd.f32 1.0, %v4016_v29  ;;  %v2246_v56 = vadd.f32 %v2245_v35, %v2244_v60 }
 0x25e   :  { %v2018_v33 = vadd.f32 1.0, %v2017_v34  ;;  %v2007_v52 = vmul.f32 0.6931472, %v2884_v45  ;;  %v2026_v35 = vmul.f32 -0.5, %v3952_v25  ;;  %v2153_v44 = vsub.f32 %v1621_v6, %v1995_v4 }
 0x25f   :  { %v1709_v28 = vsub.f32 0.0, %v1671_v49  ;;  %v1783_v22 = vmul.f32 1.442695, %v1710_v62  ;;  %2903 = vlog2.f32 %v2041_v63  ;;  %v2248_v61 = vadd.f32 %v2247_v20, %v2246_v56 }
 0x260   :  { %v1290_v7 = vpop.xlane.xlu0 %1289  ;;  %v4027_v46 = vpop.eup %2887  ;;  %v2004_v49 = vsel %vm3997_vm7, %v3974_v59, %v1998_v2  ;;  %v2010_v38 = vmul.f32 %v3915_v48, %v2009_v51  ;;  %v2249_v58 = vsel %vm2207_vm0, %v2152_v21, 0.0  ;;  %vm4040_vm8 = vcmp.lt.f32.partialorder %v2020_v37, 0.0004427343 }
 0x261   :  { %v4014_v50 = vmul.f32 -1.0, %v1290_v7  ;;  %v1781_v12 = vmul.f32 1.442695, %v1709_v28  ;;  %v2890_v24 = vpop.eup %2889  ;;  %v2059_v41 = vadd.f32 1.0, %v4027_v46  ;;  %vm4044_vm9 = vcmp.lt.f32.partialorder %v2011_v57, 0.0004427343 }
 0x262   :  { %v1287_v7 = vpop.xlane.xlu1 %1286  ;;  %v4037_v40 = vpop.eup %2891  ;;  %v2035_v19 = vmul.f32 -0.5, %v3967_v17  ;;  %v2154_v48 = vsub.f32 %v1622_v26, %v2004_v49  ;;  %v2013_v13 = vsel %vm4044_vm9, %v2010_v38, %v2007_v52  ;;  %v2250_v60 = vadd.f32 %v2249_v58, %v2248_v61 }
 0x263   :  { %v1674_v54 = vand.u32 2147483647, %v4014_v50  ;;  %2905 = vpow2.f32 %v1781_v12  ;;  %v2894_v6 = vpop.eup %2893  ;;  %v2027_v1 = vadd.f32 1.0, %v2026_v35  ;;  %v2029_v30 = vand.u32 2147483647, %v3952_v25 }
 0x264   :  { %2907 = vpow2.f32 %v1783_v22  ;;  %v4054_v45 = vmul.f32 -1.0, %v1287_v7  ;;  %v2251_v34 = vsel %vm2207_vm0, %v2153_v44, 0.0  ;;  %v2016_v28 = vmul.f32 0.6931472, %v2890_v24 }
 0x265   :  { %2909 = vlog2.f32 %v2059_v41  ;;  %v1712_v62 = vsub.f32 0.0, %v1674_v54  ;;  %v2068_v21 = vadd.f32 1.0, %v4037_v40  ;;  %v2896_v37 = vpop.eup %2895  ;;  %v2155_v39 = vsub.f32 %v1623_v43, %v2013_v13 }
 0x266   :  { %v2025_v26 = vmul.f32 0.6931472, %v2894_v6  ;;  %v2044_v51 = vmul.f32 -0.5, %v4016_v29  ;;  %v1673_v20 = vand.u32 2147483647, %v4054_v45  ;;  %v4062_v63 = vpop.eup %2897  ;;  %v2019_v22 = vmul.f32 %v3939_v5, %v2018_v33 }
 0x267   :  { %v1787_v2 = vmul.f32 1.442695, %v1712_v62  ;;  %v2036_v12 = vadd.f32 1.0, %v2035_v19  ;;  %v2038_v56 = vand.u32 2147483647, %v3967_v17  ;;  %v2253_v57 = vsel %vm2207_vm0, %v2154_v48, 0.0 }
 0x268   :  { %v4066_v4 = vpop.eup %2899  ;;  %v2252_v52 = vadd.f32 %v2251_v34, %v2250_v60  ;;  %v2028_v18 = vmul.f32 %v3952_v25, %v2027_v1  ;;  %vm4070_vm10 = vcmp.lt.f32.partialorder %v2029_v30, 0.0004427343  ;;  %v2022_v54 = vsel %vm4040_vm8, %v2019_v22, %v2016_v28 }
 0x269   :  { %2911 = vpow2.f32 %v1787_v2  ;;  %v2077_v5 = vadd.f32 1.0, %v4066_v4  ;;  %v1711_v33 = vsub.f32 0.0, %v1673_v20  ;;  %v2255_v61 = vsel %vm2207_vm0, %v2155_v39, 0.0  ;;  %v2902_v25 = vpop.eup %2901 }
 0x26a   :  { %2913 = vlog2.f32 %v2068_v21  ;;  %v2031_v49 = vsel %vm4070_vm10, %v2028_v18, %v2025_v26  ;;  %v2045_v35 = vadd.f32 1.0, %v2044_v51  ;;  %v2086_v24 = vadd.f32 1.0, %v4062_v63 }
 0x26b   :  { %v2034_v44 = vmul.f32 0.6931472, %v2896_v37  ;;  %v2053_v38 = vmul.f32 -0.5, %v3994_v23  ;;  %v2047_v41 = vand.u32 2147483647, %v4016_v29  ;;  %2915 = vlog2.f32 %v2077_v5 }
 0x26c   :  { %v2904_v7 = vpop.eup %2903  ;;  %v2156_v58 = vsub.f32 %v1624_v3, %v2022_v54  ;;  %v2254_v55 = vadd.f32 %v2253_v57, %v2252_v52  ;;  %v2037_v59 = vmul.f32 %v3967_v17, %v2036_v12  ;;  %vm4086_vm11 = vcmp.lt.f32.partialorder %v2038_v56, 0.0004427343 }
 0x26d   :  { %v2157_v48 = vsub.f32 %v1625_v16, %v2031_v49  ;;  %v2043_v13 = vmul.f32 0.6931472, %v2904_v7  ;;  %v2062_v62 = vmul.f32 -0.5, %v4027_v46  ;;  %v1785_v60 = vmul.f32 1.442695, %v1711_v33 }
 0x26e   :  { %v2256_v47 = vadd.f32 %v2255_v61, %v2254_v55  ;;  %v2046_v3 = vmul.f32 %v4016_v29, %v2045_v35  ;;  %2917 = vlog2.f32 %v2086_v24  ;;  %v2040_v30 = vsel %vm4086_vm11, %v2037_v59, %v2034_v44 }
 0x26f   :  { %v2054_v34 = vadd.f32 1.0, %v2053_v38  ;;  %vm4101_vm12 = vcmp.lt.f32.partialorder %v2047_v41, 0.0004427343  ;;  %2919 = vpow2.f32 %v1785_v60  ;;  %v2257_v16 = vsel %vm2207_vm0, %v2156_v58, 0.0 }
 0x270   :  { %v4090_v6 = vpop.eup %2905  ;;  %v2056_v21 = vand.u32 2147483647, %v3994_v23  ;;  %v2049_v29 = vsel %vm4101_vm12, %v2046_v3, %v2043_v13  ;;  %v2259_v2 = vsel %vm2207_vm0, %v2157_v48, 0.0  ;;  %v2052_v37 = vmul.f32 0.6931472, %v2902_v25 }
 0x271   :  { %v4095_v1 = vpop.eup %2907  ;;  %v2095_v17 = vadd.f32 1.0, %v4090_v6  ;;  %v2063_v39 = vadd.f32 1.0, %v2062_v62  ;;  %v2158_v51 = vsub.f32 %v1626_v8, %v2040_v30  ;;  %v2258_v20 = vadd.f32 %v2257_v16, %v2256_v47 }
 0x272   :  { %v2910_v27 = vpop.eup %2909  ;;  %v2104_v26 = vadd.f32 1.0, %v4095_v1  ;;  %v2071_v22 = vmul.f32 -0.5, %v4037_v40  ;;  %v2065_v12 = vand.u32 2147483647, %v4027_v46  ;;  %v2055_v56 = vmul.f32 %v3994_v23, %v2054_v34 }
 0x273   :  { %2921 = vlog2.f32 %v2095_v17  ;;  %v2159_v57 = vsub.f32 %v1627_v9, %v2049_v29  ;;  %v2061_v52 = vmul.f32 0.6931472, %v2910_v27  ;;  %v2080_v18 = vmul.f32 -0.5, %v4066_v4 }
 0x274   :  { %v2260_v54 = vadd.f32 %v2259_v2, %v2258_v20  ;;  %v1628_v5 = vmin.f32 %v3869_v15, 0.0  ;;  %vm4122_vm13 = vcmp.lt.f32.partialorder %v2056_v21, 0.0004427343  ;;  %v1629_v8 = vmin.f32 %v3926_v11, 0.0 }
 0x275   :  { %v2058_v23 = vsel %vm4122_vm13, %v2055_v56, %v2052_v37  ;;  %v2064_v32 = vmul.f32 %v4027_v46, %v2063_v39  ;;  %2923 = vlog2.f32 %v2104_v26  ;;  %v2261_v61 = vsel %vm2207_vm0, %v2158_v51, 0.0 }
 0x276   :  { %v4119_v43 = vpop.eup %2911  ;;  %v2072_v49 = vadd.f32 1.0, %v2071_v22  ;;  %v2074_v15 = vand.u32 2147483647, %v4037_v40  ;;  %vm2066_vm14 = vcmp.lt.f32.partialorder %v2065_v12, 0.0004427343  ;;  %v2263_v35 = vsel %vm2207_vm0, %v2159_v57, 0.0 }
 0x277   :  { %v2122_v9 = vadd.f32 1.0, %v4119_v43  ;;  %v2914_v33 = vpop.eup %2913  ;;  %v2067_v24 = vsel %vm2066_vm14, %v2064_v32, %v2061_v52  ;;  %v2081_v25 = vadd.f32 1.0, %v2080_v18  ;;  %v2160_v44 = vsub.f32 %v1628_v5, %v2058_v23 }
 0x278   :  { %v2916_v11 = vpop.eup %2915  ;;  %v2262_v38 = vadd.f32 %v2261_v61, %v2260_v54  ;;  %v2089_v46 = vmul.f32 -0.5, %v4062_v63  ;;  %v2083_v41 = vand.u32 2147483647, %v4066_v4  ;;  %v2070_v7 = vmul.f32 0.6931472, %v2914_v33 }
 0x279   :  { %2925 = vlog2.f32 %v2122_v9  ;;  %v2079_v58 = vmul.f32 0.6931472, %v2916_v11  ;;  %v2098_v55 = vmul.f32 -0.5, %v4090_v6  ;;  %v1630_v19 = vmin.f32 %v3913_v14, 0.0 }
 0x27a   :  { %v2264_v59 = vadd.f32 %v2263_v35, %v2262_v38  ;;  %v2161_v48 = vsub.f32 %v1629_v8, %v2067_v24  ;;  %v2073_v62 = vmul.f32 %v4037_v40, %v2072_v49  ;;  %vm4139_vm15 = vcmp.lt.f32.partialorder %v2074_v15, 0.0004427343 }
 0x27b   :  { %v2918_v13 = vpop.eup %2917  ;;  %v1631_v47 = vmin.f32 %v3969_v36, 0.0  ;;  %v2082_v3 = vmul.f32 %v4066_v4, %v2081_v25  ;;  %v2265_v30 = vsel %vm2207_vm0, %v2160_v44, 0.0  ;;  %v2090_v34 = vadd.f32 1.0, %v2089_v46 }
 0x27c   :  { %v4145_v17 = vpop.eup %2919  ;;  %v2092_v28 = vand.u32 2147483647, %v4062_v63  ;;  %vm2084_vm1 = vcmp.lt.f32.partialorder %v2083_v41, 0.0004427343  ;;  %v2076_v40 = vsel %vm4139_vm15, %v2073_v62, %v2070_v7  ;;  %v2099_v16 = vadd.f32 1.0, %v2098_v55 }
 0x27d   :  { %v2085_v27 = vsel %vm2084_vm1, %v2082_v3, %v2079_v58  ;;  %v2113_v21 = vadd.f32 1.0, %v4145_v17  ;;  %v2266_v29 = vadd.f32 %v2265_v30, %v2264_v59  ;;  %v2267_v36 = vsel %vm2207_vm0, %v2161_v48, 0.0 }
 0x27e   :  { %v2107_v4 = vmul.f32 -0.5, %v4095_v1  ;;  %v2101_v2 = vand.u32 2147483647, %v4090_v6  ;;  %v2088_v37 = vmul.f32 0.6931472, %v2918_v13  ;;  %v2125_v26 = vmul.f32 -0.5, %v4119_v43 }
 0x27f   :  { %2927 = vlog2.f32 %v2113_v21  ;;  %v2162_v51 = vsub.f32 %v1630_v19, %v2076_v40  ;;  %v2163_v20 = vsub.f32 %v1631_v47, %v2085_v27  ;;  %v1331_v22 = vadd.s32 296, %v3531_v0 }
 0x280   :  { %v2922_v14 = vpop.eup %2921  ;;  %v2268_v12 = vadd.f32 %v2267_v36, %v2266_v29  ;;  %v2091_v56 = vmul.f32 %v4062_v63, %v2090_v34  ;;  %v2100_v57 = vmul.f32 %v4090_v6, %v2099_v16  ;;  %v1632_v18 = vmin.f32 %v3965_v10, 0.0 }
 0x281   :  { %v2097_v39 = vmul.f32 0.6931472, %v2922_v14  ;;  %vm4160_vm2 = vcmp.lt.f32.partialorder %v2092_v28, 0.0004427343  ;;  %v1633_v5 = vmin.f32 %v3986_v31, 0.0  ;;  %v2108_v8 = vadd.f32 1.0, %v2107_v4 }
 0x282   :  { %v2924_v52 = vpop.eup %2923  ;;  %vm2102_vm3 = vcmp.lt.f32.partialorder %v2101_v2, 0.0004427343  ;;  %v2094_v42 = vsel %vm4160_vm2, %v2091_v56, %v2088_v37  ;;  %v2126_v23 = vadd.f32 1.0, %v2125_v26  ;;  %v2269_v63 = vsel %vm2207_vm0, %v2162_v51, 0.0 }
 0x283   :  { %v2103_v0 = vsel %vm2102_vm3, %v2100_v57, %v2097_v39  ;;  %v2271_v6 = vsel %vm2207_vm0, %v2163_v20, 0.0  ;;  %v2110_v10 = vand.u32 2147483647, %v4095_v1  ;;  %v2128_v9 = vand.u32 2147483647, %v4119_v43 }
 0x284   :  { %v2270_v33 = vadd.f32 %v2269_v63, %v2268_v12  ;;  %v2106_v61 = vmul.f32 0.6931472, %v2924_v52  ;;  %v2116_v31 = vmul.f32 -0.5, %v4145_v17  ;;  %v2164_v15 = vsub.f32 %v1632_v18, %v2094_v42 }
 0x285   :  { %v2165_v35 = vsub.f32 %v1633_v5, %v2103_v0  ;;  %v2109_v25 = vmul.f32 %v4095_v1, %v2108_v8  ;;  %v2127_v11 = vmul.f32 %v4119_v43, %v2126_v23  ;;  %vm1484_vm4 = vcmp.lt.s32.totalorder %v1331_v22, 300 }
 0x286   :  { %v2926_v32 = vpop.eup %2925  ;;  %v2272_v24 = vadd.f32 %v2271_v6, %v2270_v33  ;;  %vm2111_vm5 = vcmp.lt.f32.partialorder %v2110_v10, 0.0004427343  ;;  %vm2129_vm6 = vcmp.lt.f32.partialorder %v2128_v9, 0.0004427343  ;;  %v1634_v44 = vmin.f32 %v3971_v53, 0.0 }
 0x287   :  { %v2124_v49 = vmul.f32 0.6931472, %v2926_v32  ;;  %v2112_v38 = vsel %vm2111_vm5, %v2109_v25, %v2106_v61  ;;  %v2117_v41 = vadd.f32 1.0, %v2116_v31  ;;  %v2273_v7 = vsel %vm2207_vm0, %v2164_v15, 0.0 }
 0x288   :  { %v2275_v58 = vsel %vm2207_vm0, %v2165_v35, 0.0  ;;  %v1636_v55 = vmin.f32 %v4014_v50, 0.0  ;;  %v2119_v59 = vand.u32 2147483647, %v4145_v17  ;;  %v2274_v19 = vadd.f32 %v2273_v7, %v2272_v24 }
 0x289   :  { %v2130_v46 = vsel %vm2129_vm6, %v2127_v11, %v2124_v49  ;;  %v2166_v48 = vsub.f32 %v1634_v44, %v2112_v38  ;;  %v2954_v62 = vmov 0.0   ;;  %v2118_v47 = vmul.f32 %v4145_v17, %v2117_v41 }
 0x28a   :  { %v2168_v43 = vsub.f32 %v1636_v55, %v2130_v46  ;;  %v2276_v13 = vadd.f32 %v2275_v58, %v2274_v19  ;;  %v2481_v60 = vsel %vm1484_vm4, 1.0, %v2954_v62  ;;  %v1635_v3 = vmin.f32 %v4054_v45, 0.0 }
 0x28b   :  { %vm2120_vm7 = vcmp.lt.f32.partialorder %v2119_v59, 0.0004427343  ;;  %v2277_v34 = vsel %vm2207_vm0, %v2166_v48, 0.0  ;;  %vm2296_vm8 = vcmask 0  }
 0x28c   :  { %v2928_v1 = vpop.eup %2927  ;;  %v2206_v50 = vmul.f32 %v2481_v60, %v2168_v43  ;;  %v2278_v14 = vadd.f32 %v2277_v34, %v2276_v13  ;;  %2297 = vst.msk [vmem:[#allocation2] sm:$0x1] %vm2296_vm8, %v2954_v62 }
 0x28d   :  { %v2115_v53 = vmul.f32 0.6931472, %v2928_v1 }
 0x28e   :  { %v2281_v16 = vsel %vm2207_vm0, %v2206_v50, 0.0 }
 0x28f   :  { %v2121_v30 = vsel %vm2120_vm7, %v2118_v47, %v2115_v53 }
 0x290   :  { %v2167_v28 = vsub.f32 %v1635_v3, %v2121_v30 }
 0x292   :  { %v2279_v40 = vsel %vm2207_vm0, %v2167_v28, 0.0 }
 0x293   :  { %v2280_v27 = vadd.f32 %v2279_v40, %v2278_v14  ;;  %v2298_v39 = vld [vmem:[#allocation2] sm:$0x1] }
 0x295   :  { %v2282_v21 = vadd.f32 %v2281_v16, %v2280_v27 }
 0x297   :  { %2283 = vadd.xlane.f32.xlu1 %v2282_v21 }
 0x320   :  { %v2284_v17 = vpop.xlane.xlu1 %2283 }
 0x321   :  { %v2285_v29 = vrot.slane %v2284_v17, 4 }
 0x323   :  { %v2286_v45 = vadd.f32 %v2285_v29, %v2284_v17 }
 0x325   :  { %v2287_v36 = vrot.slane %v2286_v45, 2 }
 0x327   :  { %v2288_v4 = vadd.f32 %v2287_v36, %v2286_v45 }
 0x329   :  { %v2289_v2 = vrot.slane %v2288_v4, 1 }
 0x32b   :  { %v2290_v37 = vadd.f32 %v2289_v2, %v2288_v4 }
 0x32d   :  { %2768 = vpush %v2290_v37 }
 0x35e   :  { %s2769_s15 = spop %2768 }
 0x35f   :  { %v2299_v26 = vstv %s2769_s15 }
 0x360   :  { %v2300_v51 = vadd.f32 %v2299_v26, %v2298_v39 }
 0x362   :  { %2302 = vst.msk [vmem:[#allocation2] sm:$0x1] %vm2296_vm8, %v2300_v51 }
 0x363   :  { %2940 = shalt.err (!%p2937_p4)
}
 0x364   :  { %2312 = dma.vmem_to_hbm [thread:$0]  %s2310_s1, 16, %s4194_s4, [#allocation3]  }
 0x365   :  { %2949 = dma.done.wait [#allocation3], 16  }
 0x366   :  { %2950 = vsyncadd [#allocation3], 4294967280 }
 0x367   :  { %2316 = vsyncpa [#allocation3], 1 }

</bundles_post_ra>
